<compile_context>
chip_gen: v5e
topology: v5e:2x2
jax: 0.10.0
libtpu: 0.0.40
codegen_flags: <defaults>
</compile_context>

<pallas_src>
import functools

import jax
import jax.numpy as jnp
from jax.experimental import pallas as pl
from jax.experimental.pallas import tpu as pltpu


# ----------------------------- Fused kernel ----------------------------------
def fused_lstm_kernel(tokens_ref, h0_ref, c0_ref, emb_ref, w_ih_ref, w_hh_ref,
                      b_ref, fc_w_ref, fc_b_ref, udrop_ref, out_ref,
                      xw_scr, hseq_scr, *, T, Bp, H, keep_prob):
    TB = T * Bp
    V = emb_ref.shape[0]

    # ---- Embedding lookup as one-hot @ table (MXU, no gather) ----------------
    tok = tokens_ref[...]                                            # (TB, 1) i32
    vocab_iota = jax.lax.broadcasted_iota(jnp.int32, (TB, V), 1)
    one_hot = (vocab_iota == tok).astype(jnp.float32)                # (TB, V)
    x2d = jnp.dot(one_hot, emb_ref[...],
                  preferred_element_type=jnp.float32)                # (TB, E)

    # ---- Hoisted input projection: per-gate, gate-major layout ---------------
    # xw_scr[g, t] holds x_t @ W_ih_g + b_g for timestep t, shape (Bp, H).
    for g in range(4):
        xw = jnp.dot(x2d, w_ih_ref[g],
                     preferred_element_type=jnp.float32) + b_ref[g]  # (TB, H)
        xw_scr[g] = xw.reshape(T, Bp, H)

    # Hoist loop-invariant recurrent weights once.
    w_hh_i = w_hh_ref[0]
    w_hh_f = w_hh_ref[1]
    w_hh_g = w_hh_ref[2]
    w_hh_o = w_hh_ref[3]

    # ---- Serial recurrence (single invocation, unrolled over T) --------------
    h = h0_ref[...]                                                  # (Bp, H)
    c = c0_ref[...]                                                  # (Bp, H)
    for t in range(T):
        pre_i = xw_scr[0, t] + jnp.dot(h, w_hh_i, preferred_element_type=jnp.float32)
        pre_f = xw_scr[1, t] + jnp.dot(h, w_hh_f, preferred_element_type=jnp.float32)
        pre_g = xw_scr[2, t] + jnp.dot(h, w_hh_g, preferred_element_type=jnp.float32)
        pre_o = xw_scr[3, t] + jnp.dot(h, w_hh_o, preferred_element_type=jnp.float32)

        i_t = jax.nn.sigmoid(pre_i)
        f_t = jax.nn.sigmoid(pre_f)
        g_t = jnp.tanh(pre_g)
        o_t = jax.nn.sigmoid(pre_o)

        c = f_t * c + i_t * g_t
        h = o_t * jnp.tanh(c)
        hseq_scr[t] = h

    # ---- Dropout (threshold + inverted scaling) + FC epilogue ----------------
    hs = hseq_scr[...].reshape(TB, H)                                # (TB, H)
    keep = (udrop_ref[...] < keep_prob).astype(jnp.float32)          # (TB, H)
    hd = hs * keep * (1.0 / keep_prob)                               # inverted dropout

    out_ref[...] = (jnp.dot(hd, fc_w_ref[...],
                            preferred_element_type=jnp.float32)
                    + fc_b_ref[...]).astype(out_ref.dtype)           # (TB, Opad)


# ------------------------------ Full model ------------------------------------
def lstm_model_forward(tokens, params, *, dropout_p, rng_key):
    """tokens: (T, B) int32 -> (T*B, output_dim) float32."""
    T, B = tokens.shape
    V, E = params["embedding"].shape
    H = params["w_hh"].shape[-1]
    O = params["fc_w"].shape[-1]

    Bp = ((B + 7) // 8) * 8                 # pad batch to sublane quantum
    Opad = ((O + 127) // 128) * 128         # pad FC output to lane quantum
    TB = T * Bp
    keep_prob = 1.0 - dropout_p

    k_h0, k_c0, k_drop = jax.random.split(rng_key, 3)
    # h0, c0 ~ randn (matches torch.randn in the reference forward)
    h0 = jax.random.normal(k_h0, (Bp, H), dtype=jnp.float32)
    c0 = jax.random.normal(k_c0, (Bp, H), dtype=jnp.float32)
    # Uniform[0,1) draws for the dropout mask (randomness must come from host
    # RNG; thresholding/scaling stays fused in-kernel).
    udrop = jax.random.uniform(k_drop, (TB, H), dtype=jnp.float32)

    # Pad batch with token 0 (rows sliced off after the kernel).
    tok_p = jnp.zeros((T, Bp), jnp.int32).at[:, :B].set(tokens)
    tok_flat = tok_p.reshape(TB, 1)

    # Lane-dense FC weights (zero-padded output columns).
    fc_w_pad = jnp.zeros((H, Opad), jnp.float32).at[:, :O].set(params["fc_w"])
    fc_b_pad = jnp.zeros((1, Opad), jnp.float32).at[:, :O].set(params["fc_b"])

    kernel = functools.partial(fused_lstm_kernel, T=T, Bp=Bp, H=H,
                               keep_prob=keep_prob)

    out_pad = pl.pallas_call(
        kernel,
        out_shape=jax.ShapeDtypeStruct((TB, Opad), jnp.float32),
        in_specs=[
            pl.BlockSpec(memory_space=pltpu.VMEM),   # tokens (TB, 1)
            pl.BlockSpec(memory_space=pltpu.VMEM),   # h0 (Bp, H)
            pl.BlockSpec(memory_space=pltpu.VMEM),   # c0 (Bp, H)
            pl.BlockSpec(memory_space=pltpu.VMEM),   # embedding (V, E)
            pl.BlockSpec(memory_space=pltpu.VMEM),   # w_ih (4, E, H)
            pl.BlockSpec(memory_space=pltpu.VMEM),   # w_hh (4, H, H)
            pl.BlockSpec(memory_space=pltpu.VMEM),   # b_gates (4, 1, H)
            pl.BlockSpec(memory_space=pltpu.VMEM),   # fc_w (H, Opad)
            pl.BlockSpec(memory_space=pltpu.VMEM),   # fc_b (1, Opad)
            pl.BlockSpec(memory_space=pltpu.VMEM),   # dropout uniforms (TB, H)
        ],
        out_specs=pl.BlockSpec(memory_space=pltpu.VMEM),
        scratch_shapes=[
            pltpu.VMEM((4, T, Bp, H), jnp.float32),  # hoisted x @ W_ih + b
            pltpu.VMEM((T, Bp, H), jnp.float32),     # per-step hidden outputs
        ],
    )(tok_flat, h0, c0, params["embedding"], params["w_ih"], params["w_hh"],
      params["b_gates"], fc_w_pad, fc_b_pad, udrop)

    # Strip batch / output padding; row order (t, b) matches .view(T*B, -1).
    out = out_pad.reshape(T, Bp, Opad)[:, :B, :O].reshape(T * B, O)
    return out


def init_params(key, input_dim, embedding_dim, hidden_dim, output_dim):
    ks = jax.random.split(key, 6)
    s = 0.1
    return {
        "embedding": s * jax.random.normal(ks[0], (input_dim, embedding_dim), jnp.float32),
        # gate-major, pre-transposed: w_ih[g] = W_ih[g*H:(g+1)*H, :].T, gates (i, f, g, o)
        "w_ih": s * jax.random.normal(ks[1], (4, embedding_dim, hidden_dim), jnp.float32),
        "w_hh": s * jax.random.normal(ks[2], (4, hidden_dim, hidden_dim), jnp.float32),
        # b_ih + b_hh folded, per gate
        "b_gates": s * jax.random.normal(ks[3], (4, 1, hidden_dim), jnp.float32),
        "fc_w": s * jax.random.normal(ks[4], (hidden_dim, output_dim), jnp.float32),
        "fc_b": s * jax.random.normal(ks[5], (1, output_dim), jnp.float32),
    }


if __name__ == "__main__":
    # Small shapes: vocab=50, embed=16, hidden=32, output=8, seq=8, batch=4
    INPUT_DIM, EMBED_DIM, HIDDEN_DIM, OUTPUT_DIM = 50, 16, 32, 8
    T, B = 8, 4
    DROPOUT_P = 0.6

    key = jax.random.PRNGKey(0)
    k_params, k_tokens, k_fwd = jax.random.split(key, 3)

    params = init_params(k_params, INPUT_DIM, EMBED_DIM, HIDDEN_DIM, OUTPUT_DIM)
    tokens = jax.random.randint(k_tokens, (T, B), 0, INPUT_DIM, dtype=jnp.int32)

    out = lstm_model_forward(tokens, params, dropout_p=DROPOUT_P, rng_key=k_fwd)
    out = jax.block_until_ready(out)
    assert out.shape == (T * B, OUTPUT_DIM), out.shape
    assert bool(jnp.all(jnp.isfinite(out)))
    print("KERNEL_OK")
</pallas_src>

<mosaic_0001>
module attributes {stable_mosaic.version = 11 : i64} {
  func.func @fused_lstm_kernel(%arg0: memref<64x1xi32, #tpu.memory_space<vmem>>, %arg1: memref<8x32xf32, #tpu.memory_space<vmem>>, %arg2: memref<8x32xf32, #tpu.memory_space<vmem>>, %arg3: memref<50x16xf32, #tpu.memory_space<vmem>>, %arg4: memref<4x16x32xf32, #tpu.memory_space<vmem>>, %arg5: memref<4x32x32xf32, #tpu.memory_space<vmem>>, %arg6: memref<4x1x32xf32, #tpu.memory_space<vmem>>, %arg7: memref<32x128xf32, #tpu.memory_space<vmem>>, %arg8: memref<1x128xf32, #tpu.memory_space<vmem>>, %arg9: memref<64x32xf32, #tpu.memory_space<vmem>>, %arg10: memref<64x128xf32, #tpu.memory_space<vmem>>, %arg11: memref<4x8x8x32xf32, #tpu.memory_space<vmem>>, %arg12: memref<8x8x32xf32, #tpu.memory_space<vmem>>) attributes {dimension_semantics = [], scalar_prefetch = 0 : i64, scratch_operands = 2 : i64, tpu.core_type = #tpu.core_type<tc>} {
    %c0 = arith.constant 0 : index
    %c0_0 = arith.constant 0 : index
    %0 = vector.load %arg0[%c0, %c0_0] : memref<64x1xi32, #tpu.memory_space<vmem>>, vector<64x1xi32>
    %1 = tpu.iota {dimensions = array<i32: 1>} : vector<64x50xi32>
    %2 = vector.broadcast %0 : vector<64x1xi32> to vector<64x50xi32>
    %3 = arith.cmpi eq, %1, %2 : vector<64x50xi32>
    %4 = arith.extui %3 : vector<64x50xi1> to vector<64x50xi32>
    %5 = arith.sitofp %4 : vector<64x50xi32> to vector<64x50xf32>
    %c0_1 = arith.constant 0 : index
    %c0_2 = arith.constant 0 : index
    %6 = vector.load %arg3[%c0_1, %c0_2] : memref<50x16xf32, #tpu.memory_space<vmem>>, vector<50x16xf32>
    %cst = arith.constant dense<0.000000e+00> : vector<64x16xf32>
    %7 = tpu.matmul %5, %6, %cst {dimension_numbers = #tpu.dot_dimension_numbers<[1], [0], [0], [1], [0, 0, 1, 1], [], []>} : vector<64x50xf32>, vector<50x16xf32>, vector<64x16xf32> -> vector<64x16xf32>
    %c0_3 = arith.constant 0 : index
    %c0_4 = arith.constant 0 : index
    %c0_5 = arith.constant 0 : index
    %8 = vector.load %arg4[%c0_3, %c0_4, %c0_5] : memref<4x16x32xf32, #tpu.memory_space<vmem>>, vector<1x16x32xf32>
    %9 = vector.shape_cast %8 : vector<1x16x32xf32> to vector<16x32xf32>
    %cst_6 = arith.constant dense<0.000000e+00> : vector<64x32xf32>
    %10 = tpu.matmul %7, %9, %cst_6 {dimension_numbers = #tpu.dot_dimension_numbers<[1], [0], [0], [1], [0, 0, 1, 1], [], []>} : vector<64x16xf32>, vector<16x32xf32>, vector<64x32xf32> -> vector<64x32xf32>
    %c0_7 = arith.constant 0 : index
    %c0_8 = arith.constant 0 : index
    %c0_9 = arith.constant 0 : index
    %11 = vector.load %arg6[%c0_7, %c0_8, %c0_9] : memref<4x1x32xf32, #tpu.memory_space<vmem>>, vector<1x1x32xf32>
    %12 = vector.shape_cast %11 : vector<1x1x32xf32> to vector<1x32xf32>
    %13 = vector.broadcast %12 : vector<1x32xf32> to vector<64x32xf32>
    %14 = arith.addf %10, %13 : vector<64x32xf32>
    %15 = vector.shape_cast %14 : vector<64x32xf32> to vector<8x8x32xf32>
    %c0_10 = arith.constant 0 : index
    %c0_11 = arith.constant 0 : index
    %c0_12 = arith.constant 0 : index
    %c0_13 = arith.constant 0 : index
    %16 = vector.load %arg11[%c0_10, %c0_11, %c0_12, %c0_13] : memref<4x8x8x32xf32, #tpu.memory_space<vmem>>, vector<1x8x8x32xf32>
    %17 = vector.shape_cast %16 : vector<1x8x8x32xf32> to vector<8x8x32xf32>
    %18 = vector.shape_cast %15 : vector<8x8x32xf32> to vector<1x8x8x32xf32>
    tpu.vector_store %arg11[%c0_10, %c0_11, %c0_12, %c0_13], %18 {strides = array<i32>} : memref<4x8x8x32xf32, #tpu.memory_space<vmem>>, vector<1x8x8x32xf32>,
    %c1 = arith.constant 1 : index
    %c0_14 = arith.constant 0 : index
    %c0_15 = arith.constant 0 : index
    %19 = vector.load %arg4[%c1, %c0_14, %c0_15] : memref<4x16x32xf32, #tpu.memory_space<vmem>>, vector<1x16x32xf32>
    %20 = vector.shape_cast %19 : vector<1x16x32xf32> to vector<16x32xf32>
    %cst_16 = arith.constant dense<0.000000e+00> : vector<64x32xf32>
    %21 = tpu.matmul %7, %20, %cst_16 {dimension_numbers = #tpu.dot_dimension_numbers<[1], [0], [0], [1], [0, 0, 1, 1], [], []>} : vector<64x16xf32>, vector<16x32xf32>, vector<64x32xf32> -> vector<64x32xf32>
    %c1_17 = arith.constant 1 : index
    %c0_18 = arith.constant 0 : index
    %c0_19 = arith.constant 0 : index
    %22 = vector.load %arg6[%c1_17, %c0_18, %c0_19] : memref<4x1x32xf32, #tpu.memory_space<vmem>>, vector<1x1x32xf32>
    %23 = vector.shape_cast %22 : vector<1x1x32xf32> to vector<1x32xf32>
    %24 = vector.broadcast %23 : vector<1x32xf32> to vector<64x32xf32>
    %25 = arith.addf %21, %24 : vector<64x32xf32>
    %26 = vector.shape_cast %25 : vector<64x32xf32> to vector<8x8x32xf32>
    %c1_20 = arith.constant 1 : index
    %c0_21 = arith.constant 0 : index
    %c0_22 = arith.constant 0 : index
    %c0_23 = arith.constant 0 : index
    %27 = vector.load %arg11[%c1_20, %c0_21, %c0_22, %c0_23] : memref<4x8x8x32xf32, #tpu.memory_space<vmem>>, vector<1x8x8x32xf32>
    %28 = vector.shape_cast %27 : vector<1x8x8x32xf32> to vector<8x8x32xf32>
    %29 = vector.shape_cast %26 : vector<8x8x32xf32> to vector<1x8x8x32xf32>
    tpu.vector_store %arg11[%c1_20, %c0_21, %c0_22, %c0_23], %29 {strides = array<i32>} : memref<4x8x8x32xf32, #tpu.memory_space<vmem>>, vector<1x8x8x32xf32>,
    %c2 = arith.constant 2 : index
    %c0_24 = arith.constant 0 : index
    %c0_25 = arith.constant 0 : index
    %30 = vector.load %arg4[%c2, %c0_24, %c0_25] : memref<4x16x32xf32, #tpu.memory_space<vmem>>, vector<1x16x32xf32>
    %31 = vector.shape_cast %30 : vector<1x16x32xf32> to vector<16x32xf32>
    %cst_26 = arith.constant dense<0.000000e+00> : vector<64x32xf32>
    %32 = tpu.matmul %7, %31, %cst_26 {dimension_numbers = #tpu.dot_dimension_numbers<[1], [0], [0], [1], [0, 0, 1, 1], [], []>} : vector<64x16xf32>, vector<16x32xf32>, vector<64x32xf32> -> vector<64x32xf32>
    %c2_27 = arith.constant 2 : index
    %c0_28 = arith.constant 0 : index
    %c0_29 = arith.constant 0 : index
    %33 = vector.load %arg6[%c2_27, %c0_28, %c0_29] : memref<4x1x32xf32, #tpu.memory_space<vmem>>, vector<1x1x32xf32>
    %34 = vector.shape_cast %33 : vector<1x1x32xf32> to vector<1x32xf32>
    %35 = vector.broadcast %34 : vector<1x32xf32> to vector<64x32xf32>
    %36 = arith.addf %32, %35 : vector<64x32xf32>
    %37 = vector.shape_cast %36 : vector<64x32xf32> to vector<8x8x32xf32>
    %c2_30 = arith.constant 2 : index
    %c0_31 = arith.constant 0 : index
    %c0_32 = arith.constant 0 : index
    %c0_33 = arith.constant 0 : index
    %38 = vector.load %arg11[%c2_30, %c0_31, %c0_32, %c0_33] : memref<4x8x8x32xf32, #tpu.memory_space<vmem>>, vector<1x8x8x32xf32>
    %39 = vector.shape_cast %38 : vector<1x8x8x32xf32> to vector<8x8x32xf32>
    %40 = vector.shape_cast %37 : vector<8x8x32xf32> to vector<1x8x8x32xf32>
    tpu.vector_store %arg11[%c2_30, %c0_31, %c0_32, %c0_33], %40 {strides = array<i32>} : memref<4x8x8x32xf32, #tpu.memory_space<vmem>>, vector<1x8x8x32xf32>,
    %c3 = arith.constant 3 : index
    %c0_34 = arith.constant 0 : index
    %c0_35 = arith.constant 0 : index
    %41 = vector.load %arg4[%c3, %c0_34, %c0_35] : memref<4x16x32xf32, #tpu.memory_space<vmem>>, vector<1x16x32xf32>
    %42 = vector.shape_cast %41 : vector<1x16x32xf32> to vector<16x32xf32>
    %cst_36 = arith.constant dense<0.000000e+00> : vector<64x32xf32>
    %43 = tpu.matmul %7, %42, %cst_36 {dimension_numbers = #tpu.dot_dimension_numbers<[1], [0], [0], [1], [0, 0, 1, 1], [], []>} : vector<64x16xf32>, vector<16x32xf32>, vector<64x32xf32> -> vector<64x32xf32>
    %c3_37 = arith.constant 3 : index
    %c0_38 = arith.constant 0 : index
    %c0_39 = arith.constant 0 : index
    %44 = vector.load %arg6[%c3_37, %c0_38, %c0_39] : memref<4x1x32xf32, #tpu.memory_space<vmem>>, vector<1x1x32xf32>
    %45 = vector.shape_cast %44 : vector<1x1x32xf32> to vector<1x32xf32>
    %46 = vector.broadcast %45 : vector<1x32xf32> to vector<64x32xf32>
    %47 = arith.addf %43, %46 : vector<64x32xf32>
    %48 = vector.shape_cast %47 : vector<64x32xf32> to vector<8x8x32xf32>
    %c3_40 = arith.constant 3 : index
    %c0_41 = arith.constant 0 : index
    %c0_42 = arith.constant 0 : index
    %c0_43 = arith.constant 0 : index
    %49 = vector.load %arg11[%c3_40, %c0_41, %c0_42, %c0_43] : memref<4x8x8x32xf32, #tpu.memory_space<vmem>>, vector<1x8x8x32xf32>
    %50 = vector.shape_cast %49 : vector<1x8x8x32xf32> to vector<8x8x32xf32>
    %51 = vector.shape_cast %48 : vector<8x8x32xf32> to vector<1x8x8x32xf32>
    tpu.vector_store %arg11[%c3_40, %c0_41, %c0_42, %c0_43], %51 {strides = array<i32>} : memref<4x8x8x32xf32, #tpu.memory_space<vmem>>, vector<1x8x8x32xf32>,
    %c0_44 = arith.constant 0 : index
    %c0_45 = arith.constant 0 : index
    %c0_46 = arith.constant 0 : index
    %52 = vector.load %arg5[%c0_44, %c0_45, %c0_46] : memref<4x32x32xf32, #tpu.memory_space<vmem>>, vector<1x32x32xf32>
    %53 = vector.shape_cast %52 : vector<1x32x32xf32> to vector<32x32xf32>
    %c1_47 = arith.constant 1 : index
    %c0_48 = arith.constant 0 : index
    %c0_49 = arith.constant 0 : index
    %54 = vector.load %arg5[%c1_47, %c0_48, %c0_49] : memref<4x32x32xf32, #tpu.memory_space<vmem>>, vector<1x32x32xf32>
    %55 = vector.shape_cast %54 : vector<1x32x32xf32> to vector<32x32xf32>
    %c2_50 = arith.constant 2 : index
    %c0_51 = arith.constant 0 : index
    %c0_52 = arith.constant 0 : index
    %56 = vector.load %arg5[%c2_50, %c0_51, %c0_52] : memref<4x32x32xf32, #tpu.memory_space<vmem>>, vector<1x32x32xf32>
    %57 = vector.shape_cast %56 : vector<1x32x32xf32> to vector<32x32xf32>
    %c3_53 = arith.constant 3 : index
    %c0_54 = arith.constant 0 : index
    %c0_55 = arith.constant 0 : index
    %58 = vector.load %arg5[%c3_53, %c0_54, %c0_55] : memref<4x32x32xf32, #tpu.memory_space<vmem>>, vector<1x32x32xf32>
    %59 = vector.shape_cast %58 : vector<1x32x32xf32> to vector<32x32xf32>
    %c0_56 = arith.constant 0 : index
    %c0_57 = arith.constant 0 : index
    %60 = vector.load %arg1[%c0_56, %c0_57] : memref<8x32xf32, #tpu.memory_space<vmem>>, vector<8x32xf32>
    %c0_58 = arith.constant 0 : index
    %c0_59 = arith.constant 0 : index
    %61 = vector.load %arg2[%c0_58, %c0_59] : memref<8x32xf32, #tpu.memory_space<vmem>>, vector<8x32xf32>
    %c0_60 = arith.constant 0 : index
    %c0_61 = arith.constant 0 : index
    %c0_62 = arith.constant 0 : index
    %c0_63 = arith.constant 0 : index
    %62 = vector.load %arg11[%c0_60, %c0_61, %c0_62, %c0_63] : memref<4x8x8x32xf32, #tpu.memory_space<vmem>>, vector<1x1x8x32xf32>
    %63 = vector.shape_cast %62 : vector<1x1x8x32xf32> to vector<8x32xf32>
    %cst_64 = arith.constant dense<0.000000e+00> : vector<8x32xf32>
    %64 = tpu.matmul %60, %53, %cst_64 {dimension_numbers = #tpu.dot_dimension_numbers<[1], [0], [0], [1], [0, 0, 1, 1], [], []>} : vector<8x32xf32>, vector<32x32xf32>, vector<8x32xf32> -> vector<8x32xf32>
    %65 = arith.addf %63, %64 : vector<8x32xf32>
    %c1_65 = arith.constant 1 : index
    %c0_66 = arith.constant 0 : index
    %c0_67 = arith.constant 0 : index
    %c0_68 = arith.constant 0 : index
    %66 = vector.load %arg11[%c1_65, %c0_66, %c0_67, %c0_68] : memref<4x8x8x32xf32, #tpu.memory_space<vmem>>, vector<1x1x8x32xf32>
    %67 = vector.shape_cast %66 : vector<1x1x8x32xf32> to vector<8x32xf32>
    %cst_69 = arith.constant dense<0.000000e+00> : vector<8x32xf32>
    %68 = tpu.matmul %60, %55, %cst_69 {dimension_numbers = #tpu.dot_dimension_numbers<[1], [0], [0], [1], [0, 0, 1, 1], [], []>} : vector<8x32xf32>, vector<32x32xf32>, vector<8x32xf32> -> vector<8x32xf32>
    %69 = arith.addf %67, %68 : vector<8x32xf32>
    %c2_70 = arith.constant 2 : index
    %c0_71 = arith.constant 0 : index
    %c0_72 = arith.constant 0 : index
    %c0_73 = arith.constant 0 : index
    %70 = vector.load %arg11[%c2_70, %c0_71, %c0_72, %c0_73] : memref<4x8x8x32xf32, #tpu.memory_space<vmem>>, vector<1x1x8x32xf32>
    %71 = vector.shape_cast %70 : vector<1x1x8x32xf32> to vector<8x32xf32>
    %cst_74 = arith.constant dense<0.000000e+00> : vector<8x32xf32>
    %72 = tpu.matmul %60, %57, %cst_74 {dimension_numbers = #tpu.dot_dimension_numbers<[1], [0], [0], [1], [0, 0, 1, 1], [], []>} : vector<8x32xf32>, vector<32x32xf32>, vector<8x32xf32> -> vector<8x32xf32>
    %73 = arith.addf %71, %72 : vector<8x32xf32>
    %c3_75 = arith.constant 3 : index
    %c0_76 = arith.constant 0 : index
    %c0_77 = arith.constant 0 : index
    %c0_78 = arith.constant 0 : index
    %74 = vector.load %arg11[%c3_75, %c0_76, %c0_77, %c0_78] : memref<4x8x8x32xf32, #tpu.memory_space<vmem>>, vector<1x1x8x32xf32>
    %75 = vector.shape_cast %74 : vector<1x1x8x32xf32> to vector<8x32xf32>
    %cst_79 = arith.constant dense<0.000000e+00> : vector<8x32xf32>
    %76 = tpu.matmul %60, %59, %cst_79 {dimension_numbers = #tpu.dot_dimension_numbers<[1], [0], [0], [1], [0, 0, 1, 1], [], []>} : vector<8x32xf32>, vector<32x32xf32>, vector<8x32xf32> -> vector<8x32xf32>
    %77 = arith.addf %75, %76 : vector<8x32xf32>
    %78 = arith.negf %65 : vector<8x32xf32>
    %79 = math.exp %78 : vector<8x32xf32>
    %cst_80 = arith.constant 1.000000e+00 : f32
    %80 = vector.broadcast %cst_80 : f32 to vector<8x32xf32>
    %81 = arith.addf %80, %79 : vector<8x32xf32>
    %82 = arith.divf %80, %81 : vector<8x32xf32>
    %83 = arith.negf %69 : vector<8x32xf32>
    %84 = math.exp %83 : vector<8x32xf32>
    %cst_81 = arith.constant 1.000000e+00 : f32
    %85 = vector.broadcast %cst_81 : f32 to vector<8x32xf32>
    %86 = arith.addf %85, %84 : vector<8x32xf32>
    %87 = arith.divf %85, %86 : vector<8x32xf32>
    %88 = math.tanh %73 : vector<8x32xf32>
    %89 = arith.negf %77 : vector<8x32xf32>
    %90 = math.exp %89 : vector<8x32xf32>
    %cst_82 = arith.constant 1.000000e+00 : f32
    %91 = vector.broadcast %cst_82 : f32 to vector<8x32xf32>
    %92 = arith.addf %91, %90 : vector<8x32xf32>
    %93 = arith.divf %91, %92 : vector<8x32xf32>
    %94 = arith.mulf %87, %61 : vector<8x32xf32>
    %95 = arith.mulf %82, %88 : vector<8x32xf32>
    %96 = arith.addf %94, %95 : vector<8x32xf32>
    %97 = math.tanh %96 : vector<8x32xf32>
    %98 = arith.mulf %93, %97 : vector<8x32xf32>
    %c0_83 = arith.constant 0 : index
    %c0_84 = arith.constant 0 : index
    %c0_85 = arith.constant 0 : index
    %99 = vector.load %arg12[%c0_83, %c0_84, %c0_85] : memref<8x8x32xf32, #tpu.memory_space<vmem>>, vector<1x8x32xf32>
    %100 = vector.shape_cast %99 : vector<1x8x32xf32> to vector<8x32xf32>
    %101 = vector.shape_cast %98 : vector<8x32xf32> to vector<1x8x32xf32>
    tpu.vector_store %arg12[%c0_83, %c0_84, %c0_85], %101 {strides = array<i32>} : memref<8x8x32xf32, #tpu.memory_space<vmem>>, vector<1x8x32xf32>,
    %c0_86 = arith.constant 0 : index
    %c1_87 = arith.constant 1 : index
    %c0_88 = arith.constant 0 : index
    %c0_89 = arith.constant 0 : index
    %102 = vector.load %arg11[%c0_86, %c1_87, %c0_88, %c0_89] : memref<4x8x8x32xf32, #tpu.memory_space<vmem>>, vector<1x1x8x32xf32>
    %103 = vector.shape_cast %102 : vector<1x1x8x32xf32> to vector<8x32xf32>
    %cst_90 = arith.constant dense<0.000000e+00> : vector<8x32xf32>
    %104 = tpu.matmul %98, %53, %cst_90 {dimension_numbers = #tpu.dot_dimension_numbers<[1], [0], [0], [1], [0, 0, 1, 1], [], []>} : vector<8x32xf32>, vector<32x32xf32>, vector<8x32xf32> -> vector<8x32xf32>
    %105 = arith.addf %103, %104 : vector<8x32xf32>
    %c1_91 = arith.constant 1 : index
    %c1_92 = arith.constant 1 : index
    %c0_93 = arith.constant 0 : index
    %c0_94 = arith.constant 0 : index
    %106 = vector.load %arg11[%c1_91, %c1_92, %c0_93, %c0_94] : memref<4x8x8x32xf32, #tpu.memory_space<vmem>>, vector<1x1x8x32xf32>
    %107 = vector.shape_cast %106 : vector<1x1x8x32xf32> to vector<8x32xf32>
    %cst_95 = arith.constant dense<0.000000e+00> : vector<8x32xf32>
    %108 = tpu.matmul %98, %55, %cst_95 {dimension_numbers = #tpu.dot_dimension_numbers<[1], [0], [0], [1], [0, 0, 1, 1], [], []>} : vector<8x32xf32>, vector<32x32xf32>, vector<8x32xf32> -> vector<8x32xf32>
    %109 = arith.addf %107, %108 : vector<8x32xf32>
    %c2_96 = arith.constant 2 : index
    %c1_97 = arith.constant 1 : index
    %c0_98 = arith.constant 0 : index
    %c0_99 = arith.constant 0 : index
    %110 = vector.load %arg11[%c2_96, %c1_97, %c0_98, %c0_99] : memref<4x8x8x32xf32, #tpu.memory_space<vmem>>, vector<1x1x8x32xf32>
    %111 = vector.shape_cast %110 : vector<1x1x8x32xf32> to vector<8x32xf32>
    %cst_100 = arith.constant dense<0.000000e+00> : vector<8x32xf32>
    %112 = tpu.matmul %98, %57, %cst_100 {dimension_numbers = #tpu.dot_dimension_numbers<[1], [0], [0], [1], [0, 0, 1, 1], [], []>} : vector<8x32xf32>, vector<32x32xf32>, vector<8x32xf32> -> vector<8x32xf32>
    %113 = arith.addf %111, %112 : vector<8x32xf32>
    %c3_101 = arith.constant 3 : index
    %c1_102 = arith.constant 1 : index
    %c0_103 = arith.constant 0 : index
    %c0_104 = arith.constant 0 : index
    %114 = vector.load %arg11[%c3_101, %c1_102, %c0_103, %c0_104] : memref<4x8x8x32xf32, #tpu.memory_space<vmem>>, vector<1x1x8x32xf32>
    %115 = vector.shape_cast %114 : vector<1x1x8x32xf32> to vector<8x32xf32>
    %cst_105 = arith.constant dense<0.000000e+00> : vector<8x32xf32>
    %116 = tpu.matmul %98, %59, %cst_105 {dimension_numbers = #tpu.dot_dimension_numbers<[1], [0], [0], [1], [0, 0, 1, 1], [], []>} : vector<8x32xf32>, vector<32x32xf32>, vector<8x32xf32> -> vector<8x32xf32>
    %117 = arith.addf %115, %116 : vector<8x32xf32>
    %118 = arith.negf %105 : vector<8x32xf32>
    %119 = math.exp %118 : vector<8x32xf32>
    %cst_106 = arith.constant 1.000000e+00 : f32
    %120 = vector.broadcast %cst_106 : f32 to vector<8x32xf32>
    %121 = arith.addf %120, %119 : vector<8x32xf32>
    %122 = arith.divf %120, %121 : vector<8x32xf32>
    %123 = arith.negf %109 : vector<8x32xf32>
    %124 = math.exp %123 : vector<8x32xf32>
    %cst_107 = arith.constant 1.000000e+00 : f32
    %125 = vector.broadcast %cst_107 : f32 to vector<8x32xf32>
    %126 = arith.addf %125, %124 : vector<8x32xf32>
    %127 = arith.divf %125, %126 : vector<8x32xf32>
    %128 = math.tanh %113 : vector<8x32xf32>
    %129 = arith.negf %117 : vector<8x32xf32>
    %130 = math.exp %129 : vector<8x32xf32>
    %cst_108 = arith.constant 1.000000e+00 : f32
    %131 = vector.broadcast %cst_108 : f32 to vector<8x32xf32>
    %132 = arith.addf %131, %130 : vector<8x32xf32>
    %133 = arith.divf %131, %132 : vector<8x32xf32>
    %134 = arith.mulf %127, %96 : vector<8x32xf32>
    %135 = arith.mulf %122, %128 : vector<8x32xf32>
    %136 = arith.addf %134, %135 : vector<8x32xf32>
    %137 = math.tanh %136 : vector<8x32xf32>
    %138 = arith.mulf %133, %137 : vector<8x32xf32>
    %c1_109 = arith.constant 1 : index
    %c0_110 = arith.constant 0 : index
    %c0_111 = arith.constant 0 : index
    %139 = vector.load %arg12[%c1_109, %c0_110, %c0_111] : memref<8x8x32xf32, #tpu.memory_space<vmem>>, vector<1x8x32xf32>
    %140 = vector.shape_cast %139 : vector<1x8x32xf32> to vector<8x32xf32>
    %141 = vector.shape_cast %138 : vector<8x32xf32> to vector<1x8x32xf32>
    tpu.vector_store %arg12[%c1_109, %c0_110, %c0_111], %141 {strides = array<i32>} : memref<8x8x32xf32, #tpu.memory_space<vmem>>, vector<1x8x32xf32>,
    %c0_112 = arith.constant 0 : index
    %c2_113 = arith.constant 2 : index
    %c0_114 = arith.constant 0 : index
    %c0_115 = arith.constant 0 : index
    %142 = vector.load %arg11[%c0_112, %c2_113, %c0_114, %c0_115] : memref<4x8x8x32xf32, #tpu.memory_space<vmem>>, vector<1x1x8x32xf32>
    %143 = vector.shape_cast %142 : vector<1x1x8x32xf32> to vector<8x32xf32>
    %cst_116 = arith.constant dense<0.000000e+00> : vector<8x32xf32>
    %144 = tpu.matmul %138, %53, %cst_116 {dimension_numbers = #tpu.dot_dimension_numbers<[1], [0], [0], [1], [0, 0, 1, 1], [], []>} : vector<8x32xf32>, vector<32x32xf32>, vector<8x32xf32> -> vector<8x32xf32>
    %145 = arith.addf %143, %144 : vector<8x32xf32>
    %c1_117 = arith.constant 1 : index
    %c2_118 = arith.constant 2 : index
    %c0_119 = arith.constant 0 : index
    %c0_120 = arith.constant 0 : index
    %146 = vector.load %arg11[%c1_117, %c2_118, %c0_119, %c0_120] : memref<4x8x8x32xf32, #tpu.memory_space<vmem>>, vector<1x1x8x32xf32>
    %147 = vector.shape_cast %146 : vector<1x1x8x32xf32> to vector<8x32xf32>
    %cst_121 = arith.constant dense<0.000000e+00> : vector<8x32xf32>
    %148 = tpu.matmul %138, %55, %cst_121 {dimension_numbers = #tpu.dot_dimension_numbers<[1], [0], [0], [1], [0, 0, 1, 1], [], []>} : vector<8x32xf32>, vector<32x32xf32>, vector<8x32xf32> -> vector<8x32xf32>
    %149 = arith.addf %147, %148 : vector<8x32xf32>
    %c2_122 = arith.constant 2 : index
    %c2_123 = arith.constant 2 : index
    %c0_124 = arith.constant 0 : index
    %c0_125 = arith.constant 0 : index
    %150 = vector.load %arg11[%c2_122, %c2_123, %c0_124, %c0_125] : memref<4x8x8x32xf32, #tpu.memory_space<vmem>>, vector<1x1x8x32xf32>
    %151 = vector.shape_cast %150 : vector<1x1x8x32xf32> to vector<8x32xf32>
    %cst_126 = arith.constant dense<0.000000e+00> : vector<8x32xf32>
    %152 = tpu.matmul %138, %57, %cst_126 {dimension_numbers = #tpu.dot_dimension_numbers<[1], [0], [0], [1], [0, 0, 1, 1], [], []>} : vector<8x32xf32>, vector<32x32xf32>, vector<8x32xf32> -> vector<8x32xf32>
    %153 = arith.addf %151, %152 : vector<8x32xf32>
    %c3_127 = arith.constant 3 : index
    %c2_128 = arith.constant 2 : index
    %c0_129 = arith.constant 0 : index
    %c0_130 = arith.constant 0 : index
    %154 = vector.load %arg11[%c3_127, %c2_128, %c0_129, %c0_130] : memref<4x8x8x32xf32, #tpu.memory_space<vmem>>, vector<1x1x8x32xf32>
    %155 = vector.shape_cast %154 : vector<1x1x8x32xf32> to vector<8x32xf32>
    %cst_131 = arith.constant dense<0.000000e+00> : vector<8x32xf32>
    %156 = tpu.matmul %138, %59, %cst_131 {dimension_numbers = #tpu.dot_dimension_numbers<[1], [0], [0], [1], [0, 0, 1, 1], [], []>} : vector<8x32xf32>, vector<32x32xf32>, vector<8x32xf32> -> vector<8x32xf32>
    %157 = arith.addf %155, %156 : vector<8x32xf32>
    %158 = arith.negf %145 : vector<8x32xf32>
    %159 = math.exp %158 : vector<8x32xf32>
    %cst_132 = arith.constant 1.000000e+00 : f32
    %160 = vector.broadcast %cst_132 : f32 to vector<8x32xf32>
    %161 = arith.addf %160, %159 : vector<8x32xf32>
    %162 = arith.divf %160, %161 : vector<8x32xf32>
    %163 = arith.negf %149 : vector<8x32xf32>
    %164 = math.exp %163 : vector<8x32xf32>
    %cst_133 = arith.constant 1.000000e+00 : f32
    %165 = vector.broadcast %cst_133 : f32 to vector<8x32xf32>
    %166 = arith.addf %165, %164 : vector<8x32xf32>
    %167 = arith.divf %165, %166 : vector<8x32xf32>
    %168 = math.tanh %153 : vector<8x32xf32>
    %169 = arith.negf %157 : vector<8x32xf32>
    %170 = math.exp %169 : vector<8x32xf32>
    %cst_134 = arith.constant 1.000000e+00 : f32
    %171 = vector.broadcast %cst_134 : f32 to vector<8x32xf32>
    %172 = arith.addf %171, %170 : vector<8x32xf32>
    %173 = arith.divf %171, %172 : vector<8x32xf32>
    %174 = arith.mulf %167, %136 : vector<8x32xf32>
    %175 = arith.mulf %162, %168 : vector<8x32xf32>
    %176 = arith.addf %174, %175 : vector<8x32xf32>
    %177 = math.tanh %176 : vector<8x32xf32>
    %178 = arith.mulf %173, %177 : vector<8x32xf32>
    %c2_135 = arith.constant 2 : index
    %c0_136 = arith.constant 0 : index
    %c0_137 = arith.constant 0 : index
    %179 = vector.load %arg12[%c2_135, %c0_136, %c0_137] : memref<8x8x32xf32, #tpu.memory_space<vmem>>, vector<1x8x32xf32>
    %180 = vector.shape_cast %179 : vector<1x8x32xf32> to vector<8x32xf32>
    %181 = vector.shape_cast %178 : vector<8x32xf32> to vector<1x8x32xf32>
    tpu.vector_store %arg12[%c2_135, %c0_136, %c0_137], %181 {strides = array<i32>} : memref<8x8x32xf32, #tpu.memory_space<vmem>>, vector<1x8x32xf32>,
    %c0_138 = arith.constant 0 : index
    %c3_139 = arith.constant 3 : index
    %c0_140 = arith.constant 0 : index
    %c0_141 = arith.constant 0 : index
    %182 = vector.load %arg11[%c0_138, %c3_139, %c0_140, %c0_141] : memref<4x8x8x32xf32, #tpu.memory_space<vmem>>, vector<1x1x8x32xf32>
    %183 = vector.shape_cast %182 : vector<1x1x8x32xf32> to vector<8x32xf32>
    %cst_142 = arith.constant dense<0.000000e+00> : vector<8x32xf32>
    %184 = tpu.matmul %178, %53, %cst_142 {dimension_numbers = #tpu.dot_dimension_numbers<[1], [0], [0], [1], [0, 0, 1, 1], [], []>} : vector<8x32xf32>, vector<32x32xf32>, vector<8x32xf32> -> vector<8x32xf32>
    %185 = arith.addf %183, %184 : vector<8x32xf32>
    %c1_143 = arith.constant 1 : index
    %c3_144 = arith.constant 3 : index
    %c0_145 = arith.constant 0 : index
    %c0_146 = arith.constant 0 : index
    %186 = vector.load %arg11[%c1_143, %c3_144, %c0_145, %c0_146] : memref<4x8x8x32xf32, #tpu.memory_space<vmem>>, vector<1x1x8x32xf32>
    %187 = vector.shape_cast %186 : vector<1x1x8x32xf32> to vector<8x32xf32>
    %cst_147 = arith.constant dense<0.000000e+00> : vector<8x32xf32>
    %188 = tpu.matmul %178, %55, %cst_147 {dimension_numbers = #tpu.dot_dimension_numbers<[1], [0], [0], [1], [0, 0, 1, 1], [], []>} : vector<8x32xf32>, vector<32x32xf32>, vector<8x32xf32> -> vector<8x32xf32>
    %189 = arith.addf %187, %188 : vector<8x32xf32>
    %c2_148 = arith.constant 2 : index
    %c3_149 = arith.constant 3 : index
    %c0_150 = arith.constant 0 : index
    %c0_151 = arith.constant 0 : index
    %190 = vector.load %arg11[%c2_148, %c3_149, %c0_150, %c0_151] : memref<4x8x8x32xf32, #tpu.memory_space<vmem>>, vector<1x1x8x32xf32>
    %191 = vector.shape_cast %190 : vector<1x1x8x32xf32> to vector<8x32xf32>
    %cst_152 = arith.constant dense<0.000000e+00> : vector<8x32xf32>
    %192 = tpu.matmul %178, %57, %cst_152 {dimension_numbers = #tpu.dot_dimension_numbers<[1], [0], [0], [1], [0, 0, 1, 1], [], []>} : vector<8x32xf32>, vector<32x32xf32>, vector<8x32xf32> -> vector<8x32xf32>
    %193 = arith.addf %191, %192 : vector<8x32xf32>
    %c3_153 = arith.constant 3 : index
    %c3_154 = arith.constant 3 : index
    %c0_155 = arith.constant 0 : index
    %c0_156 = arith.constant 0 : index
    %194 = vector.load %arg11[%c3_153, %c3_154, %c0_155, %c0_156] : memref<4x8x8x32xf32, #tpu.memory_space<vmem>>, vector<1x1x8x32xf32>
    %195 = vector.shape_cast %194 : vector<1x1x8x32xf32> to vector<8x32xf32>
    %cst_157 = arith.constant dense<0.000000e+00> : vector<8x32xf32>
    %196 = tpu.matmul %178, %59, %cst_157 {dimension_numbers = #tpu.dot_dimension_numbers<[1], [0], [0], [1], [0, 0, 1, 1], [], []>} : vector<8x32xf32>, vector<32x32xf32>, vector<8x32xf32> -> vector<8x32xf32>
    %197 = arith.addf %195, %196 : vector<8x32xf32>
    %198 = arith.negf %185 : vector<8x32xf32>
    %199 = math.exp %198 : vector<8x32xf32>
    %cst_158 = arith.constant 1.000000e+00 : f32
    %200 = vector.broadcast %cst_158 : f32 to vector<8x32xf32>
    %201 = arith.addf %200, %199 : vector<8x32xf32>
    %202 = arith.divf %200, %201 : vector<8x32xf32>
    %203 = arith.negf %189 : vector<8x32xf32>
    %204 = math.exp %203 : vector<8x32xf32>
    %cst_159 = arith.constant 1.000000e+00 : f32
    %205 = vector.broadcast %cst_159 : f32 to vector<8x32xf32>
    %206 = arith.addf %205, %204 : vector<8x32xf32>
    %207 = arith.divf %205, %206 : vector<8x32xf32>
    %208 = math.tanh %193 : vector<8x32xf32>
    %209 = arith.negf %197 : vector<8x32xf32>
    %210 = math.exp %209 : vector<8x32xf32>
    %cst_160 = arith.constant 1.000000e+00 : f32
    %211 = vector.broadcast %cst_160 : f32 to vector<8x32xf32>
    %212 = arith.addf %211, %210 : vector<8x32xf32>
    %213 = arith.divf %211, %212 : vector<8x32xf32>
    %214 = arith.mulf %207, %176 : vector<8x32xf32>
    %215 = arith.mulf %202, %208 : vector<8x32xf32>
    %216 = arith.addf %214, %215 : vector<8x32xf32>
    %217 = math.tanh %216 : vector<8x32xf32>
    %218 = arith.mulf %213, %217 : vector<8x32xf32>
    %c3_161 = arith.constant 3 : index
    %c0_162 = arith.constant 0 : index
    %c0_163 = arith.constant 0 : index
    %219 = vector.load %arg12[%c3_161, %c0_162, %c0_163] : memref<8x8x32xf32, #tpu.memory_space<vmem>>, vector<1x8x32xf32>
    %220 = vector.shape_cast %219 : vector<1x8x32xf32> to vector<8x32xf32>
    %221 = vector.shape_cast %218 : vector<8x32xf32> to vector<1x8x32xf32>
    tpu.vector_store %arg12[%c3_161, %c0_162, %c0_163], %221 {strides = array<i32>} : memref<8x8x32xf32, #tpu.memory_space<vmem>>, vector<1x8x32xf32>,
    %c0_164 = arith.constant 0 : index
    %c4 = arith.constant 4 : index
    %c0_165 = arith.constant 0 : index
    %c0_166 = arith.constant 0 : index
    %222 = vector.load %arg11[%c0_164, %c4, %c0_165, %c0_166] : memref<4x8x8x32xf32, #tpu.memory_space<vmem>>, vector<1x1x8x32xf32>
    %223 = vector.shape_cast %222 : vector<1x1x8x32xf32> to vector<8x32xf32>
    %cst_167 = arith.constant dense<0.000000e+00> : vector<8x32xf32>
    %224 = tpu.matmul %218, %53, %cst_167 {dimension_numbers = #tpu.dot_dimension_numbers<[1], [0], [0], [1], [0, 0, 1, 1], [], []>} : vector<8x32xf32>, vector<32x32xf32>, vector<8x32xf32> -> vector<8x32xf32>
    %225 = arith.addf %223, %224 : vector<8x32xf32>
    %c1_168 = arith.constant 1 : index
    %c4_169 = arith.constant 4 : index
    %c0_170 = arith.constant 0 : index
    %c0_171 = arith.constant 0 : index
    %226 = vector.load %arg11[%c1_168, %c4_169, %c0_170, %c0_171] : memref<4x8x8x32xf32, #tpu.memory_space<vmem>>, vector<1x1x8x32xf32>
    %227 = vector.shape_cast %226 : vector<1x1x8x32xf32> to vector<8x32xf32>
    %cst_172 = arith.constant dense<0.000000e+00> : vector<8x32xf32>
    %228 = tpu.matmul %218, %55, %cst_172 {dimension_numbers = #tpu.dot_dimension_numbers<[1], [0], [0], [1], [0, 0, 1, 1], [], []>} : vector<8x32xf32>, vector<32x32xf32>, vector<8x32xf32> -> vector<8x32xf32>
    %229 = arith.addf %227, %228 : vector<8x32xf32>
    %c2_173 = arith.constant 2 : index
    %c4_174 = arith.constant 4 : index
    %c0_175 = arith.constant 0 : index
    %c0_176 = arith.constant 0 : index
    %230 = vector.load %arg11[%c2_173, %c4_174, %c0_175, %c0_176] : memref<4x8x8x32xf32, #tpu.memory_space<vmem>>, vector<1x1x8x32xf32>
    %231 = vector.shape_cast %230 : vector<1x1x8x32xf32> to vector<8x32xf32>
    %cst_177 = arith.constant dense<0.000000e+00> : vector<8x32xf32>
    %232 = tpu.matmul %218, %57, %cst_177 {dimension_numbers = #tpu.dot_dimension_numbers<[1], [0], [0], [1], [0, 0, 1, 1], [], []>} : vector<8x32xf32>, vector<32x32xf32>, vector<8x32xf32> -> vector<8x32xf32>
    %233 = arith.addf %231, %232 : vector<8x32xf32>
    %c3_178 = arith.constant 3 : index
    %c4_179 = arith.constant 4 : index
    %c0_180 = arith.constant 0 : index
    %c0_181 = arith.constant 0 : index
    %234 = vector.load %arg11[%c3_178, %c4_179, %c0_180, %c0_181] : memref<4x8x8x32xf32, #tpu.memory_space<vmem>>, vector<1x1x8x32xf32>
    %235 = vector.shape_cast %234 : vector<1x1x8x32xf32> to vector<8x32xf32>
    %cst_182 = arith.constant dense<0.000000e+00> : vector<8x32xf32>
    %236 = tpu.matmul %218, %59, %cst_182 {dimension_numbers = #tpu.dot_dimension_numbers<[1], [0], [0], [1], [0, 0, 1, 1], [], []>} : vector<8x32xf32>, vector<32x32xf32>, vector<8x32xf32> -> vector<8x32xf32>
    %237 = arith.addf %235, %236 : vector<8x32xf32>
    %238 = arith.negf %225 : vector<8x32xf32>
    %239 = math.exp %238 : vector<8x32xf32>
    %cst_183 = arith.constant 1.000000e+00 : f32
    %240 = vector.broadcast %cst_183 : f32 to vector<8x32xf32>
    %241 = arith.addf %240, %239 : vector<8x32xf32>
    %242 = arith.divf %240, %241 : vector<8x32xf32>
    %243 = arith.negf %229 : vector<8x32xf32>
    %244 = math.exp %243 : vector<8x32xf32>
    %cst_184 = arith.constant 1.000000e+00 : f32
    %245 = vector.broadcast %cst_184 : f32 to vector<8x32xf32>
    %246 = arith.addf %245, %244 : vector<8x32xf32>
    %247 = arith.divf %245, %246 : vector<8x32xf32>
    %248 = math.tanh %233 : vector<8x32xf32>
    %249 = arith.negf %237 : vector<8x32xf32>
    %250 = math.exp %249 : vector<8x32xf32>
    %cst_185 = arith.constant 1.000000e+00 : f32
    %251 = vector.broadcast %cst_185 : f32 to vector<8x32xf32>
    %252 = arith.addf %251, %250 : vector<8x32xf32>
    %253 = arith.divf %251, %252 : vector<8x32xf32>
    %254 = arith.mulf %247, %216 : vector<8x32xf32>
    %255 = arith.mulf %242, %248 : vector<8x32xf32>
    %256 = arith.addf %254, %255 : vector<8x32xf32>
    %257 = math.tanh %256 : vector<8x32xf32>
    %258 = arith.mulf %253, %257 : vector<8x32xf32>
    %c4_186 = arith.constant 4 : index
    %c0_187 = arith.constant 0 : index
    %c0_188 = arith.constant 0 : index
    %259 = vector.load %arg12[%c4_186, %c0_187, %c0_188] : memref<8x8x32xf32, #tpu.memory_space<vmem>>, vector<1x8x32xf32>
    %260 = vector.shape_cast %259 : vector<1x8x32xf32> to vector<8x32xf32>
    %261 = vector.shape_cast %258 : vector<8x32xf32> to vector<1x8x32xf32>
    tpu.vector_store %arg12[%c4_186, %c0_187, %c0_188], %261 {strides = array<i32>} : memref<8x8x32xf32, #tpu.memory_space<vmem>>, vector<1x8x32xf32>,
    %c0_189 = arith.constant 0 : index
    %c5 = arith.constant 5 : index
    %c0_190 = arith.constant 0 : index
    %c0_191 = arith.constant 0 : index
    %262 = vector.load %arg11[%c0_189, %c5, %c0_190, %c0_191] : memref<4x8x8x32xf32, #tpu.memory_space<vmem>>, vector<1x1x8x32xf32>
    %263 = vector.shape_cast %262 : vector<1x1x8x32xf32> to vector<8x32xf32>
    %cst_192 = arith.constant dense<0.000000e+00> : vector<8x32xf32>
    %264 = tpu.matmul %258, %53, %cst_192 {dimension_numbers = #tpu.dot_dimension_numbers<[1], [0], [0], [1], [0, 0, 1, 1], [], []>} : vector<8x32xf32>, vector<32x32xf32>, vector<8x32xf32> -> vector<8x32xf32>
    %265 = arith.addf %263, %264 : vector<8x32xf32>
    %c1_193 = arith.constant 1 : index
    %c5_194 = arith.constant 5 : index
    %c0_195 = arith.constant 0 : index
    %c0_196 = arith.constant 0 : index
    %266 = vector.load %arg11[%c1_193, %c5_194, %c0_195, %c0_196] : memref<4x8x8x32xf32, #tpu.memory_space<vmem>>, vector<1x1x8x32xf32>
    %267 = vector.shape_cast %266 : vector<1x1x8x32xf32> to vector<8x32xf32>
    %cst_197 = arith.constant dense<0.000000e+00> : vector<8x32xf32>
    %268 = tpu.matmul %258, %55, %cst_197 {dimension_numbers = #tpu.dot_dimension_numbers<[1], [0], [0], [1], [0, 0, 1, 1], [], []>} : vector<8x32xf32>, vector<32x32xf32>, vector<8x32xf32> -> vector<8x32xf32>
    %269 = arith.addf %267, %268 : vector<8x32xf32>
    %c2_198 = arith.constant 2 : index
    %c5_199 = arith.constant 5 : index
    %c0_200 = arith.constant 0 : index
    %c0_201 = arith.constant 0 : index
    %270 = vector.load %arg11[%c2_198, %c5_199, %c0_200, %c0_201] : memref<4x8x8x32xf32, #tpu.memory_space<vmem>>, vector<1x1x8x32xf32>
    %271 = vector.shape_cast %270 : vector<1x1x8x32xf32> to vector<8x32xf32>
    %cst_202 = arith.constant dense<0.000000e+00> : vector<8x32xf32>
    %272 = tpu.matmul %258, %57, %cst_202 {dimension_numbers = #tpu.dot_dimension_numbers<[1], [0], [0], [1], [0, 0, 1, 1], [], []>} : vector<8x32xf32>, vector<32x32xf32>, vector<8x32xf32> -> vector<8x32xf32>
    %273 = arith.addf %271, %272 : vector<8x32xf32>
    %c3_203 = arith.constant 3 : index
    %c5_204 = arith.constant 5 : index
    %c0_205 = arith.constant 0 : index
    %c0_206 = arith.constant 0 : index
    %274 = vector.load %arg11[%c3_203, %c5_204, %c0_205, %c0_206] : memref<4x8x8x32xf32, #tpu.memory_space<vmem>>, vector<1x1x8x32xf32>
    %275 = vector.shape_cast %274 : vector<1x1x8x32xf32> to vector<8x32xf32>
    %cst_207 = arith.constant dense<0.000000e+00> : vector<8x32xf32>
    %276 = tpu.matmul %258, %59, %cst_207 {dimension_numbers = #tpu.dot_dimension_numbers<[1], [0], [0], [1], [0, 0, 1, 1], [], []>} : vector<8x32xf32>, vector<32x32xf32>, vector<8x32xf32> -> vector<8x32xf32>
    %277 = arith.addf %275, %276 : vector<8x32xf32>
    %278 = arith.negf %265 : vector<8x32xf32>
    %279 = math.exp %278 : vector<8x32xf32>
    %cst_208 = arith.constant 1.000000e+00 : f32
    %280 = vector.broadcast %cst_208 : f32 to vector<8x32xf32>
    %281 = arith.addf %280, %279 : vector<8x32xf32>
    %282 = arith.divf %280, %281 : vector<8x32xf32>
    %283 = arith.negf %269 : vector<8x32xf32>
    %284 = math.exp %283 : vector<8x32xf32>
    %cst_209 = arith.constant 1.000000e+00 : f32
    %285 = vector.broadcast %cst_209 : f32 to vector<8x32xf32>
    %286 = arith.addf %285, %284 : vector<8x32xf32>
    %287 = arith.divf %285, %286 : vector<8x32xf32>
    %288 = math.tanh %273 : vector<8x32xf32>
    %289 = arith.negf %277 : vector<8x32xf32>
    %290 = math.exp %289 : vector<8x32xf32>
    %cst_210 = arith.constant 1.000000e+00 : f32
    %291 = vector.broadcast %cst_210 : f32 to vector<8x32xf32>
    %292 = arith.addf %291, %290 : vector<8x32xf32>
    %293 = arith.divf %291, %292 : vector<8x32xf32>
    %294 = arith.mulf %287, %256 : vector<8x32xf32>
    %295 = arith.mulf %282, %288 : vector<8x32xf32>
    %296 = arith.addf %294, %295 : vector<8x32xf32>
    %297 = math.tanh %296 : vector<8x32xf32>
    %298 = arith.mulf %293, %297 : vector<8x32xf32>
    %c5_211 = arith.constant 5 : index
    %c0_212 = arith.constant 0 : index
    %c0_213 = arith.constant 0 : index
    %299 = vector.load %arg12[%c5_211, %c0_212, %c0_213] : memref<8x8x32xf32, #tpu.memory_space<vmem>>, vector<1x8x32xf32>
    %300 = vector.shape_cast %299 : vector<1x8x32xf32> to vector<8x32xf32>
    %301 = vector.shape_cast %298 : vector<8x32xf32> to vector<1x8x32xf32>
    tpu.vector_store %arg12[%c5_211, %c0_212, %c0_213], %301 {strides = array<i32>} : memref<8x8x32xf32, #tpu.memory_space<vmem>>, vector<1x8x32xf32>,
    %c0_214 = arith.constant 0 : index
    %c6 = arith.constant 6 : index
    %c0_215 = arith.constant 0 : index
    %c0_216 = arith.constant 0 : index
    %302 = vector.load %arg11[%c0_214, %c6, %c0_215, %c0_216] : memref<4x8x8x32xf32, #tpu.memory_space<vmem>>, vector<1x1x8x32xf32>
    %303 = vector.shape_cast %302 : vector<1x1x8x32xf32> to vector<8x32xf32>
    %cst_217 = arith.constant dense<0.000000e+00> : vector<8x32xf32>
    %304 = tpu.matmul %298, %53, %cst_217 {dimension_numbers = #tpu.dot_dimension_numbers<[1], [0], [0], [1], [0, 0, 1, 1], [], []>} : vector<8x32xf32>, vector<32x32xf32>, vector<8x32xf32> -> vector<8x32xf32>
    %305 = arith.addf %303, %304 : vector<8x32xf32>
    %c1_218 = arith.constant 1 : index
    %c6_219 = arith.constant 6 : index
    %c0_220 = arith.constant 0 : index
    %c0_221 = arith.constant 0 : index
    %306 = vector.load %arg11[%c1_218, %c6_219, %c0_220, %c0_221] : memref<4x8x8x32xf32, #tpu.memory_space<vmem>>, vector<1x1x8x32xf32>
    %307 = vector.shape_cast %306 : vector<1x1x8x32xf32> to vector<8x32xf32>
    %cst_222 = arith.constant dense<0.000000e+00> : vector<8x32xf32>
    %308 = tpu.matmul %298, %55, %cst_222 {dimension_numbers = #tpu.dot_dimension_numbers<[1], [0], [0], [1], [0, 0, 1, 1], [], []>} : vector<8x32xf32>, vector<32x32xf32>, vector<8x32xf32> -> vector<8x32xf32>
    %309 = arith.addf %307, %308 : vector<8x32xf32>
    %c2_223 = arith.constant 2 : index
    %c6_224 = arith.constant 6 : index
    %c0_225 = arith.constant 0 : index
    %c0_226 = arith.constant 0 : index
    %310 = vector.load %arg11[%c2_223, %c6_224, %c0_225, %c0_226] : memref<4x8x8x32xf32, #tpu.memory_space<vmem>>, vector<1x1x8x32xf32>
    %311 = vector.shape_cast %310 : vector<1x1x8x32xf32> to vector<8x32xf32>
    %cst_227 = arith.constant dense<0.000000e+00> : vector<8x32xf32>
    %312 = tpu.matmul %298, %57, %cst_227 {dimension_numbers = #tpu.dot_dimension_numbers<[1], [0], [0], [1], [0, 0, 1, 1], [], []>} : vector<8x32xf32>, vector<32x32xf32>, vector<8x32xf32> -> vector<8x32xf32>
    %313 = arith.addf %311, %312 : vector<8x32xf32>
    %c3_228 = arith.constant 3 : index
    %c6_229 = arith.constant 6 : index
    %c0_230 = arith.constant 0 : index
    %c0_231 = arith.constant 0 : index
    %314 = vector.load %arg11[%c3_228, %c6_229, %c0_230, %c0_231] : memref<4x8x8x32xf32, #tpu.memory_space<vmem>>, vector<1x1x8x32xf32>
    %315 = vector.shape_cast %314 : vector<1x1x8x32xf32> to vector<8x32xf32>
    %cst_232 = arith.constant dense<0.000000e+00> : vector<8x32xf32>
    %316 = tpu.matmul %298, %59, %cst_232 {dimension_numbers = #tpu.dot_dimension_numbers<[1], [0], [0], [1], [0, 0, 1, 1], [], []>} : vector<8x32xf32>, vector<32x32xf32>, vector<8x32xf32> -> vector<8x32xf32>
    %317 = arith.addf %315, %316 : vector<8x32xf32>
    %318 = arith.negf %305 : vector<8x32xf32>
    %319 = math.exp %318 : vector<8x32xf32>
    %cst_233 = arith.constant 1.000000e+00 : f32
    %320 = vector.broadcast %cst_233 : f32 to vector<8x32xf32>
    %321 = arith.addf %320, %319 : vector<8x32xf32>
    %322 = arith.divf %320, %321 : vector<8x32xf32>
    %323 = arith.negf %309 : vector<8x32xf32>
    %324 = math.exp %323 : vector<8x32xf32>
    %cst_234 = arith.constant 1.000000e+00 : f32
    %325 = vector.broadcast %cst_234 : f32 to vector<8x32xf32>
    %326 = arith.addf %325, %324 : vector<8x32xf32>
    %327 = arith.divf %325, %326 : vector<8x32xf32>
    %328 = math.tanh %313 : vector<8x32xf32>
    %329 = arith.negf %317 : vector<8x32xf32>
    %330 = math.exp %329 : vector<8x32xf32>
    %cst_235 = arith.constant 1.000000e+00 : f32
    %331 = vector.broadcast %cst_235 : f32 to vector<8x32xf32>
    %332 = arith.addf %331, %330 : vector<8x32xf32>
    %333 = arith.divf %331, %332 : vector<8x32xf32>
    %334 = arith.mulf %327, %296 : vector<8x32xf32>
    %335 = arith.mulf %322, %328 : vector<8x32xf32>
    %336 = arith.addf %334, %335 : vector<8x32xf32>
    %337 = math.tanh %336 : vector<8x32xf32>
    %338 = arith.mulf %333, %337 : vector<8x32xf32>
    %c6_236 = arith.constant 6 : index
    %c0_237 = arith.constant 0 : index
    %c0_238 = arith.constant 0 : index
    %339 = vector.load %arg12[%c6_236, %c0_237, %c0_238] : memref<8x8x32xf32, #tpu.memory_space<vmem>>, vector<1x8x32xf32>
    %340 = vector.shape_cast %339 : vector<1x8x32xf32> to vector<8x32xf32>
    %341 = vector.shape_cast %338 : vector<8x32xf32> to vector<1x8x32xf32>
    tpu.vector_store %arg12[%c6_236, %c0_237, %c0_238], %341 {strides = array<i32>} : memref<8x8x32xf32, #tpu.memory_space<vmem>>, vector<1x8x32xf32>,
    %c0_239 = arith.constant 0 : index
    %c7 = arith.constant 7 : index
    %c0_240 = arith.constant 0 : index
    %c0_241 = arith.constant 0 : index
    %342 = vector.load %arg11[%c0_239, %c7, %c0_240, %c0_241] : memref<4x8x8x32xf32, #tpu.memory_space<vmem>>, vector<1x1x8x32xf32>
    %343 = vector.shape_cast %342 : vector<1x1x8x32xf32> to vector<8x32xf32>
    %cst_242 = arith.constant dense<0.000000e+00> : vector<8x32xf32>
    %344 = tpu.matmul %338, %53, %cst_242 {dimension_numbers = #tpu.dot_dimension_numbers<[1], [0], [0], [1], [0, 0, 1, 1], [], []>} : vector<8x32xf32>, vector<32x32xf32>, vector<8x32xf32> -> vector<8x32xf32>
    %345 = arith.addf %343, %344 : vector<8x32xf32>
    %c1_243 = arith.constant 1 : index
    %c7_244 = arith.constant 7 : index
    %c0_245 = arith.constant 0 : index
    %c0_246 = arith.constant 0 : index
    %346 = vector.load %arg11[%c1_243, %c7_244, %c0_245, %c0_246] : memref<4x8x8x32xf32, #tpu.memory_space<vmem>>, vector<1x1x8x32xf32>
    %347 = vector.shape_cast %346 : vector<1x1x8x32xf32> to vector<8x32xf32>
    %cst_247 = arith.constant dense<0.000000e+00> : vector<8x32xf32>
    %348 = tpu.matmul %338, %55, %cst_247 {dimension_numbers = #tpu.dot_dimension_numbers<[1], [0], [0], [1], [0, 0, 1, 1], [], []>} : vector<8x32xf32>, vector<32x32xf32>, vector<8x32xf32> -> vector<8x32xf32>
    %349 = arith.addf %347, %348 : vector<8x32xf32>
    %c2_248 = arith.constant 2 : index
    %c7_249 = arith.constant 7 : index
    %c0_250 = arith.constant 0 : index
    %c0_251 = arith.constant 0 : index
    %350 = vector.load %arg11[%c2_248, %c7_249, %c0_250, %c0_251] : memref<4x8x8x32xf32, #tpu.memory_space<vmem>>, vector<1x1x8x32xf32>
    %351 = vector.shape_cast %350 : vector<1x1x8x32xf32> to vector<8x32xf32>
    %cst_252 = arith.constant dense<0.000000e+00> : vector<8x32xf32>
    %352 = tpu.matmul %338, %57, %cst_252 {dimension_numbers = #tpu.dot_dimension_numbers<[1], [0], [0], [1], [0, 0, 1, 1], [], []>} : vector<8x32xf32>, vector<32x32xf32>, vector<8x32xf32> -> vector<8x32xf32>
    %353 = arith.addf %351, %352 : vector<8x32xf32>
    %c3_253 = arith.constant 3 : index
    %c7_254 = arith.constant 7 : index
    %c0_255 = arith.constant 0 : index
    %c0_256 = arith.constant 0 : index
    %354 = vector.load %arg11[%c3_253, %c7_254, %c0_255, %c0_256] : memref<4x8x8x32xf32, #tpu.memory_space<vmem>>, vector<1x1x8x32xf32>
    %355 = vector.shape_cast %354 : vector<1x1x8x32xf32> to vector<8x32xf32>
    %cst_257 = arith.constant dense<0.000000e+00> : vector<8x32xf32>
    %356 = tpu.matmul %338, %59, %cst_257 {dimension_numbers = #tpu.dot_dimension_numbers<[1], [0], [0], [1], [0, 0, 1, 1], [], []>} : vector<8x32xf32>, vector<32x32xf32>, vector<8x32xf32> -> vector<8x32xf32>
    %357 = arith.addf %355, %356 : vector<8x32xf32>
    %358 = arith.negf %345 : vector<8x32xf32>
    %359 = math.exp %358 : vector<8x32xf32>
    %cst_258 = arith.constant 1.000000e+00 : f32
    %360 = vector.broadcast %cst_258 : f32 to vector<8x32xf32>
    %361 = arith.addf %360, %359 : vector<8x32xf32>
    %362 = arith.divf %360, %361 : vector<8x32xf32>
    %363 = arith.negf %349 : vector<8x32xf32>
    %364 = math.exp %363 : vector<8x32xf32>
    %cst_259 = arith.constant 1.000000e+00 : f32
    %365 = vector.broadcast %cst_259 : f32 to vector<8x32xf32>
    %366 = arith.addf %365, %364 : vector<8x32xf32>
    %367 = arith.divf %365, %366 : vector<8x32xf32>
    %368 = math.tanh %353 : vector<8x32xf32>
    %369 = arith.negf %357 : vector<8x32xf32>
    %370 = math.exp %369 : vector<8x32xf32>
    %cst_260 = arith.constant 1.000000e+00 : f32
    %371 = vector.broadcast %cst_260 : f32 to vector<8x32xf32>
    %372 = arith.addf %371, %370 : vector<8x32xf32>
    %373 = arith.divf %371, %372 : vector<8x32xf32>
    %374 = arith.mulf %367, %336 : vector<8x32xf32>
    %375 = arith.mulf %362, %368 : vector<8x32xf32>
    %376 = arith.addf %374, %375 : vector<8x32xf32>
    %377 = math.tanh %376 : vector<8x32xf32>
    %378 = arith.mulf %373, %377 : vector<8x32xf32>
    %c7_261 = arith.constant 7 : index
    %c0_262 = arith.constant 0 : index
    %c0_263 = arith.constant 0 : index
    %379 = vector.load %arg12[%c7_261, %c0_262, %c0_263] : memref<8x8x32xf32, #tpu.memory_space<vmem>>, vector<1x8x32xf32>
    %380 = vector.shape_cast %379 : vector<1x8x32xf32> to vector<8x32xf32>
    %381 = vector.shape_cast %378 : vector<8x32xf32> to vector<1x8x32xf32>
    tpu.vector_store %arg12[%c7_261, %c0_262, %c0_263], %381 {strides = array<i32>} : memref<8x8x32xf32, #tpu.memory_space<vmem>>, vector<1x8x32xf32>,
    %c0_264 = arith.constant 0 : index
    %c0_265 = arith.constant 0 : index
    %c0_266 = arith.constant 0 : index
    %382 = vector.load %arg12[%c0_264, %c0_265, %c0_266] : memref<8x8x32xf32, #tpu.memory_space<vmem>>, vector<8x8x32xf32>
    %383 = vector.shape_cast %382 : vector<8x8x32xf32> to vector<64x32xf32>
    %c0_267 = arith.constant 0 : index
    %c0_268 = arith.constant 0 : index
    %384 = vector.load %arg9[%c0_267, %c0_268] : memref<64x32xf32, #tpu.memory_space<vmem>>, vector<64x32xf32>
    %cst_269 = arith.constant 4.000000e-01 : f32
    %385 = vector.broadcast %cst_269 : f32 to vector<64x32xf32>
    %386 = arith.cmpf olt, %384, %385 : vector<64x32xf32>
    %387 = arith.extui %386 : vector<64x32xi1> to vector<64x32xi32>
    %388 = arith.sitofp %387 : vector<64x32xi32> to vector<64x32xf32>
    %389 = arith.mulf %383, %388 : vector<64x32xf32>
    %cst_270 = arith.constant 2.500000e+00 : f32
    %390 = vector.broadcast %cst_270 : f32 to vector<64x32xf32>
    %391 = arith.mulf %389, %390 : vector<64x32xf32>
    %c0_271 = arith.constant 0 : index
    %c0_272 = arith.constant 0 : index
    %392 = vector.load %arg7[%c0_271, %c0_272] : memref<32x128xf32, #tpu.memory_space<vmem>>, vector<32x128xf32>
    %cst_273 = arith.constant dense<0.000000e+00> : vector<64x128xf32>
    %393 = tpu.matmul %391, %392, %cst_273 {dimension_numbers = #tpu.dot_dimension_numbers<[1], [0], [0], [1], [0, 0, 1, 1], [], []>} : vector<64x32xf32>, vector<32x128xf32>, vector<64x128xf32> -> vector<64x128xf32>
    %c0_274 = arith.constant 0 : index
    %c0_275 = arith.constant 0 : index
    %394 = vector.load %arg8[%c0_274, %c0_275] : memref<1x128xf32, #tpu.memory_space<vmem>>, vector<1x128xf32>
    %395 = vector.broadcast %394 : vector<1x128xf32> to vector<64x128xf32>
    %396 = arith.addf %393, %395 : vector<64x128xf32>
    %c0_276 = arith.constant 0 : index
    %c0_277 = arith.constant 0 : index
    %397 = vector.load %arg10[%c0_276, %c0_277] : memref<64x128xf32, #tpu.memory_space<vmem>>, vector<64x128xf32>
    tpu.vector_store %arg10[%c0_276, %c0_277], %396 {strides = array<i32>} : memref<64x128xf32, #tpu.memory_space<vmem>>, vector<64x128xf32>,
    return
  }
}

</mosaic_0001>

<bundles_post_ra>
// kernel: tpu_custom_call.1
= control target key start
LH: loop header
LB: loop body
LE: loop exit
PB: predicated region body
PF: predicated region fallthrough
CT: control target
= control target key end

     0   :  { %15 = vsyncpa [#allocation5], 0  ;;  %s2960_s0 = inlined_call_operand.vmem [shape: s32[64,1], index: 0, kind: input, shape index: {}]   ;;  %s2961_s1 = inlined_call_operand.vmem [shape: f32[8,32], index: 1, kind: input, shape index: {}]   ;;  %s2962_s2 = inlined_call_operand.hbm [shape: f32[8,32], index: 2, kind: input, shape index: {}]   ;;  %s2963_s3 = inlined_call_operand.vmem [shape: f32[50,16], index: 3, kind: input, shape index: {}]   ;;  %s2964_s4 = inlined_call_operand.vmem [shape: f32[4,16,32], index: 4, kind: input, shape index: {}]   ;;  %s2965_s5 = inlined_call_operand.vmem [shape: f32[4,32,32], index: 5, kind: input, shape index: {}]   ;;  %s2966_s6 = inlined_call_operand.vmem [shape: f32[4,1,32], index: 6, kind: input, shape index: {}]   ;;  %s2967_s7 = inlined_call_operand.hbm [shape: f32[32,128], index: 7, kind: input, shape index: {}]   ;;  %s2968_s8 = inlined_call_operand.vmem [shape: f32[1,128], index: 8, kind: input, shape index: {}]   ;;  %s2969_s9 = inlined_call_operand.vmem [shape: f32[64,32], index: 9, kind: input, shape index: {}]   ;;  %s2970_s10 = inlined_call_operand.hbm [shape: f32[64,128], index: 10, kind: output, shape index: {}]  }
   0x1   :  { %16 = vsyncpa [#allocation8], 0 }
   0x2   :  { %17 = vsyncpa [#allocation6], 0  ;;  %s27_s15 = sshll.u32 %s2962_s2, 4  ;;  %s2292_s16 = smov [#allocation4]   ;;  %s28_s15 = int_to_ptr.hbm [resolvable:$true] %s27_s15 }
   0x3   :  { %s29_s17 = sshll.u32 %s2292_s16, 4  ;;  %s45_s20 = sshll.u32 %s2967_s7, 4  ;;  %s30_s17 = int_to_ptr.vmem [resolvable:$true] %s29_s17  ;;  %s46_s20 = int_to_ptr.hbm [resolvable:$true] %s45_s20 }
   0x4   :  { %32 = dma.hbm_to_vmem [thread:$0]  %s28_s15, 128, %s30_s17, [#allocation5]  }
   0x5   :  { %s2293_s21 = smov [#allocation7]   ;;  %s2294_s23 = smov 128  }
   0x6   :  { %s47_s22 = sshll.u32 %s2293_s21, 4  ;;  %s2295_s24 = smov 8   ;;  %s48_s22 = int_to_ptr.vmem [resolvable:$true] %s47_s22 }
   0x7   :  { %53 = dma.hbm_to_vmem [thread:$0]  %s46_s20, 512, %s48_s22, [#allocation8], %s2294_s23, %s2294_s23, %s2295_s24  }
   0x8   :  { %2286 = dma.done.wait [#allocation5], 128  }
   0x9   :  { %2287 = vsyncadd [#allocation5], 4294967168 }
   0xa   :  { %2288 = dma.done.wait [#allocation8], 512  }
   0xb   :  { %2289 = vsyncadd [#allocation8], 4294966784  ;;  %v2296_v0 = vmov 0   ;;  %v68_v1 = vld [vmem:[%s2960_s0 + $0x10] sm:$0xff]  ;;  %v66_v2 = vld [vmem:[%s2960_s0] sm:$0xff]  ;;  %vm156_vm0 = vcmask 1041408   ;;  %v74_v16 = vlaneseq }
   0xc   :  { %2063 = vset.pattern.permute.xlu1 %v2296_v0  ;;  %2062 = vset.pattern.permute.xlu0 %v2296_v0  ;;  %v70_v3 = vld [vmem:[%s2960_s0 + $0x20] sm:$0xff]  ;;  %v130_v4 = vld [vmem:[%s2963_s3 + $0x30] sm:$0x3]  ;;  %v129_v5 = vld [vmem:[%s2963_s3 + $0x28] sm:$0xff]  ;;  %vm131_vm1 = vcmask 408576   ;;  %v2297_v19 = vmov 0.0  }
   0xd   :  { %2064 = vset.pattern.permute.xlu2 %v2296_v0  ;;  %83 = vperm.xlu1 %2063, %v68_v1   ;;  %v128_v6 = vld [vmem:[%s2963_s3 + $0x20] sm:$0xff]  ;;  %v69_v7 = vld [vmem:[%s2960_s0 + $0x18] sm:$0xff]  ;;  %v67_v8 = vld [vmem:[%s2960_s0 + $0x8] sm:$0xff]  ;;  %v75_v17 = vand.u32 127, %v74_v16  ;;  %vm207_vm10 = vcmask 130048   ;;  %vm273_vm11 = vcmask 261120  }
   0xe   :  { %77 = vperm.xlu0 %2062, %v66_v2   ;;  %89 = vperm.xlu2 %2064, %v70_v3   ;;  %v127_v9 = vld [vmem:[%s2963_s3 + $0x18] sm:$0xff]  ;;  %v71_v10 = vld [vmem:[%s2960_s0 + $0x28] sm:$0xff]  ;;  %v126_v11 = vld [vmem:[%s2963_s3 + $0x10] sm:$0xff]  ;;  %s1895_s21 = sshll.u32 %s2970_s10, 4  ;;  %s1896_s21 = int_to_ptr.hbm [resolvable:$true] %s1895_s21 }
   0xf   :  { %1917 = vmatpush.msk.msra.mxu0 %vm156_vm0, %v130_v4  ;;  %v125_v12 = vld [vmem:[%s2963_s3 + $0x8] sm:$0xff]  ;;  %v73_v13 = vld [vmem:[%s2960_s0 + $0x38] sm:$0xff]  ;;  %v72_v14 = vld [vmem:[%s2960_s0 + $0x30] sm:$0xff] }
  0x10   :  { %v124_v15 = vld [vmem:[%s2963_s3] sm:$0xff]  ;;  %v202_v28 = vld [vmem:[%s2964_s4 + $0x8] sm:$0xff]  ;;  %v1935_v29 = vld [vmem:[%s2964_s4 + $0x18] sm:$0xff] }
  0x11   :  { %170 = vmatpush.msra.mxu0 %v129_v5  ;;  %246 = vmatpush.msra.mxu1 %v202_v28  ;;  %v201_v37 = vld [vmem:[%s2964_s4] sm:$0xff]  ;;  %v1934_v38 = vld [vmem:[%s2964_s4 + $0x10] sm:$0xff]  ;;  %v1957_v39 = vld [vmem:[%s2964_s4 + $0x38] sm:$0xff] }
  0x12   :  { %2051 = vmatpush.msra.mxu2 %v1935_v29  ;;  %2052 = vmatpush.msra.mxu3 %v1935_v29  ;;  %v1956_v41 = vld [vmem:[%s2964_s4 + $0x30] sm:$0xff]  ;;  %v1946_v43 = vld [vmem:[%s2964_s4 + $0x28] sm:$0xff]  ;;  %v1945_v45 = vld [vmem:[%s2964_s4 + $0x20] sm:$0xff] }
  0x13   :  { %171 = vmatpush.msra.mxu0 %v128_v6  ;;  %247 = vmatpush.msra.mxu1 %v201_v37  ;;  %v2461_v48 = vld [vmem:[%s2965_s5 + $0x58] sm:$0xff]  ;;  %v2466_v49 = vld [vmem:[%s2965_s5 + $0x50] sm:$0xff]  ;;  %v2478_v51 = vld [vmem:[%s2965_s5 + $0x48] sm:$0xff] }
  0x14   :  { %2053 = vmatpush.msra.mxu2 %v1934_v38  ;;  %2054 = vmatpush.msra.mxu3 %v1934_v38  ;;  %v2472_v50 = vld [vmem:[%s2965_s5 + $0x18] sm:$0xff]  ;;  %v2493_v54 = vld [vmem:[%s2965_s5 + $0x40] sm:$0xff]  ;;  %v2510_v57 = vld [vmem:[%s2965_s5 + $0x30] sm:$0xff] }
  0x15   :  { %86 = vperm.xlu1 %2063, %v69_v7   ;;  %172 = vmatpush.msra.mxu0 %v127_v9  ;;  %v2486_v52 = vld [vmem:[%s2965_s5 + $0x38] sm:$0xff]  ;;  %v2498_v55 = vld [vmem:[%s2961_s1] sm:$0xff]  ;;  %v2515_v58 = vld [vmem:[%s2965_s5 + $0x10] sm:$0xff]  ;;  %s2298_s1 = smov [#allocation9]  }
  0x16   :  { %80 = vperm.xlu0 %2062, %v67_v8   ;;  %92 = vperm.xlu2 %2064, %v71_v10   ;;  %v2528_v60 = vld [vmem:[%s2965_s5 + $0x28] sm:$0xff]  ;;  %v2546_v62 = vld [vmem:[%s2965_s5 + $0x20] sm:$0xff]  ;;  %v2568_v0 = vld [vmem:[%s2965_s5 + $0x78] sm:$0xff] }
  0x17   :  { %173 = vmatpush.msra.mxu0 %v126_v11  ;;  %420 = vmatpush.msrb.mxu1 %v1957_v39  ;;  %v2533_v61 = vld [vmem:[%s2965_s5 + $0x8] sm:$0xff]  ;;  %v2551_v63 = vld [vmem:[%s2965_s5] sm:$0xff]  ;;  %v2573_v1 = vld [vmem:[%s2965_s5 + $0x70] sm:$0xff] }
  0x18   :  { %362 = vmatpush.msrb.mxu3 %v1946_v43  ;;  %537 = vmatpush.msrb.mxu2 %v2461_v48  ;;  %v2583_v2 = vld [vmem:[%s2965_s5 + $0x68] sm:$0xff]  ;;  %v2591_v3 = vld [vmem:[%s2965_s5 + $0x60] sm:$0xff] }
  0x19   :  { %174 = vmatpush.msra.mxu0 %v125_v12  ;;  %421 = vmatpush.msrb.mxu1 %v1956_v41  ;;  %v2065_v4 = vld [vmem:[%s2966_s6] ss:$0 sm:$0xff]  ;;  %v2609_v5 = vld [vmem:[%s2966_s6 + $0x1] ss:$0 sm:$0xff]  ;;  %v2067_v37 = vld [vmem:[%s2966_s6 + $0x3] ss:$0 sm:$0xff] }
  0x1a   :  { %363 = vmatpush.msrb.mxu3 %v1945_v45  ;;  %538 = vmatpush.msrb.mxu2 %v2466_v49 }
  0x1b   :  { %175 = vmatpush.msra.mxu0 %v124_v15 }
  0x1c   :  { %539 = vmatpush.msrb.mxu2 %v2478_v51 }
  0x1d   :  { %98 = vperm.xlu1 %2063, %v73_v13   ;;  %304 = vmatpush.msrb.mxu0 %v1935_v29 }
  0x1e   :  { %95 = vperm.xlu0 %2062, %v72_v14   ;;  %540 = vmatpush.msrb.mxu2 %v2493_v54 }
  0x1f   :  { %305 = vmatpush.msrb.mxu0 %v1934_v38 }
  0x68   :  { %v90_v27 = vpop.permute.xlu2 %89 }
  0x69   :  { %vm104_vm6 = vcmp.eq.s32.totalorder %v75_v17, %v90_v27 }
  0x6a   :  { %v1913_v30 = vsel %vm104_vm6, 1.0, %v2297_v19 }
  0x70   :  { %v93_v31 = vpop.permute.xlu2 %92 }
  0x71   :  { %vm105_vm7 = vcmp.eq.s32.totalorder %v75_v17, %v93_v31 }
  0x72   :  { %v1914_v32 = vsel %vm105_vm7, 1.0, %v2297_v19 }
  0x7f   :  { %v84_v23 = vpop.permute.xlu1 %83 }
  0x80   :  { %v78_v18 = vpop.permute.xlu0 %77  ;;  %vm102_vm4 = vcmp.eq.s32.totalorder %v75_v17, %v84_v23 }
  0x81   :  { %vm100_vm2 = vcmp.eq.s32.totalorder %v75_v17, %v78_v18  ;;  %v1911_v24 = vsel %vm102_vm4, 1.0, %v2297_v19 }
  0x82   :  { %v1909_v20 = vsel %vm100_vm2, 1.0, %v2297_v19 }
  0x83   :  { %1918 = vmatmul.msk.f32.vlgmr.msra.gmra.mxu0 %vm131_vm1, %v1909_v20 }
  0x84   :  { %649 = vmatpush.msra.mxu0 %v2472_v50 }
  0x86   :  { %650 = vmatpush.msra.mxu0 %v2515_v58 }
  0x87   :  { %v87_v25 = vpop.permute.xlu1 %86 }
  0x88   :  { %v81_v21 = vpop.permute.xlu0 %80  ;;  %vm103_vm5 = vcmp.eq.s32.totalorder %v75_v17, %v87_v25  ;;  %651 = vmatpush.msra.mxu0 %v2533_v61 }
  0x89   :  { %vm101_vm3 = vcmp.eq.s32.totalorder %v75_v17, %v81_v21  ;;  %v1912_v26 = vsel %vm103_vm5, 1.0, %v2297_v19 }
  0x8a   :  { %v1910_v22 = vsel %vm101_vm3, 1.0, %v2297_v19  ;;  %652 = vmatpush.msra.mxu0 %v2551_v63 }
  0x8b   :  { %1919 = vmatmul.msk.f32.gmra.mxu0 %vm131_vm1, %v1910_v22 }
  0x8f   :  { %v99_v35 = vpop.permute.xlu1 %98 }
  0x90   :  { %v96_v33 = vpop.permute.xlu0 %95  ;;  %vm107_vm9 = vcmp.eq.s32.totalorder %v75_v17, %v99_v35 }
  0x91   :  { %vm106_vm8 = vcmp.eq.s32.totalorder %v75_v17, %v96_v33  ;;  %v1916_v36 = vsel %vm107_vm9, 1.0, %v2297_v19 }
  0x92   :  { %v1915_v34 = vsel %vm106_vm8, 1.0, %v2297_v19 }
  0x93   :  { %1920 = vmatmul.msk.f32.gmra.mxu0 %vm131_vm1, %v1911_v24 }
  0x9b   :  { %1921 = vmatmul.msk.f32.gmra.mxu0 %vm131_vm1, %v1912_v26 }
  0xa3   :  { %1922 = vmatmul.msk.f32.gmra.mxu0 %vm131_vm1, %v1913_v30 }
  0xab   :  { %1923 = vmatmul.msk.f32.gmra.mxu0 %vm131_vm1, %v1914_v32 }
  0xb3   :  { %1924 = vmatmul.msk.f32.gmra.mxu0 %vm131_vm1, %v1915_v34 }
  0xbb   :  { %1925 = vmatmul.msk.f32.gmra.mxu0 %vm131_vm1, %v1916_v36 }
 0x100   :  { %v177_v40 = vpop.f32.mrf.mxu0 }
 0x101   :  { %1926 = vmatmul.msk.f32.vlgmr.msra.gmra.mxu1 %vm207_vm10, %v177_v40  ;;  %1937 = vmatmul.msk.f32.vlgmr.msrb.gmra.mxu0 %vm207_vm10, %v177_v40 }
 0x102   :  { %493 = vmatpush.msra.mxu1 %v2472_v50  ;;  %718 = vmatpush.msrb.mxu0 %v2568_v0 }
 0x104   :  { %494 = vmatpush.msra.mxu1 %v2515_v58  ;;  %719 = vmatpush.msrb.mxu0 %v2573_v1 }
 0x106   :  { %495 = vmatpush.msra.mxu1 %v2533_v61  ;;  %720 = vmatpush.msrb.mxu0 %v2583_v2 }
 0x108   :  { %v180_v42 = vpop.f32.mrf.mxu0  ;;  %496 = vmatpush.msra.mxu1 %v2551_v63  ;;  %721 = vmatpush.msrb.mxu0 %v2591_v3 }
 0x109   :  { %1927 = vmatmul.msk.f32.gmra.mxu1 %vm207_vm10, %v180_v42  ;;  %1938 = vmatmul.msk.f32.gmra.mxu0 %vm207_vm10, %v180_v42 }
 0x110   :  { %v183_v44 = vpop.f32.mrf.mxu0 }
 0x111   :  { %1928 = vmatmul.msk.f32.gmra.mxu1 %vm207_vm10, %v183_v44  ;;  %1939 = vmatmul.msk.f32.vlgmr.msra.gmra.mxu2 %vm207_vm10, %v183_v44 }
 0x112   :  { %672 = vmatpush.msra.mxu2 %v2486_v52 }
 0x114   :  { %673 = vmatpush.msra.mxu2 %v2510_v57 }
 0x116   :  { %674 = vmatpush.msra.mxu2 %v2528_v60 }
 0x118   :  { %v186_v46 = vpop.f32.mrf.mxu0  ;;  %675 = vmatpush.msra.mxu2 %v2546_v62 }
 0x119   :  { %1929 = vmatmul.msk.f32.gmra.mxu1 %vm207_vm10, %v186_v46  ;;  %1940 = vmatmul.msk.f32.gmra.mxu2 %vm207_vm10, %v186_v46 }
 0x120   :  { %v189_v47 = vpop.f32.mrf.mxu0 }
 0x121   :  { %1930 = vmatmul.msk.f32.gmra.mxu1 %vm207_vm10, %v189_v47  ;;  %1941 = vmatmul.msk.f32.gmra.mxu2 %vm207_vm10, %v189_v47 }
 0x128   :  { %v192_v53 = vpop.f32.mrf.mxu0 }
 0x129   :  { %1931 = vmatmul.msk.f32.gmra.mxu1 %vm207_vm10, %v192_v53  ;;  %1942 = vmatmul.msk.f32.vlgmr.msra.gmra.mxu3 %vm207_vm10, %v192_v53 }
 0x12a   :  { %515 = vmatpush.msra.mxu3 %v2486_v52  ;;  %1981 = vmatmul.msk.f32.vlgmr.msrb.gmra.mxu2 %vm273_vm11, %v2498_v55 }
 0x12b   :  { %809 = vmatpush.msrb.mxu2 %v2472_v50 }
 0x12c   :  { %516 = vmatpush.msra.mxu3 %v2510_v57 }
 0x12d   :  { %810 = vmatpush.msrb.mxu2 %v2515_v58 }
 0x12e   :  { %517 = vmatpush.msra.mxu3 %v2528_v60 }
 0x12f   :  { %811 = vmatpush.msrb.mxu2 %v2533_v61 }
 0x130   :  { %v195_v56 = vpop.f32.mrf.mxu0  ;;  %518 = vmatpush.msra.mxu3 %v2546_v62 }
 0x131   :  { %1932 = vmatmul.msk.f32.gmra.mxu1 %vm207_vm10, %v195_v56  ;;  %1943 = vmatmul.msk.f32.gmra.mxu3 %vm207_vm10, %v195_v56 }
 0x132   :  { %812 = vmatpush.msrb.mxu2 %v2551_v63 }
 0x138   :  { %v198_v59 = vpop.f32.mrf.mxu0 }
 0x139   :  { %1933 = vmatmul.msk.f32.gmra.mxu1 %vm207_vm10, %v198_v59  ;;  %1944 = vmatmul.msk.f32.gmra.mxu3 %vm207_vm10, %v198_v59 }
 0x141   :  { %1948 = vmatmul.msk.f32.vlgmr.msrb.gmra.mxu3 %vm207_vm10, %v177_v40  ;;  %1959 = vmatmul.msk.f32.vlgmr.msrb.gmra.mxu1 %vm207_vm10, %v177_v40 }
 0x142   :  { %559 = vmatpush.msrb.mxu3 %v2568_v0  ;;  %1358 = vmatpush.msrb.mxu1 %v2568_v0 }
 0x144   :  { %560 = vmatpush.msrb.mxu3 %v2573_v1  ;;  %1359 = vmatpush.msrb.mxu1 %v2573_v1 }
 0x146   :  { %561 = vmatpush.msrb.mxu3 %v2583_v2  ;;  %1360 = vmatpush.msrb.mxu1 %v2583_v2 }
 0x148   :  { %562 = vmatpush.msrb.mxu3 %v2591_v3  ;;  %1361 = vmatpush.msrb.mxu1 %v2591_v3 }
 0x149   :  { %1949 = vmatmul.msk.f32.gmra.mxu3 %vm207_vm10, %v180_v42  ;;  %1960 = vmatmul.msk.f32.gmra.mxu1 %vm207_vm10, %v180_v42  ;;  %v2068_v42 = vld [vmem:[%s2966_s6 + $0x2] ss:$0 sm:$0xff] }
 0x151   :  { %1950 = vmatmul.msk.f32.gmra.mxu3 %vm207_vm10, %v183_v44  ;;  %1961 = vmatmul.msk.f32.gmra.mxu1 %vm207_vm10, %v183_v44 }
 0x159   :  { %1951 = vmatmul.msk.f32.gmra.mxu3 %vm207_vm10, %v186_v46  ;;  %1962 = vmatmul.msk.f32.gmra.mxu1 %vm207_vm10, %v186_v46 }
 0x161   :  { %1952 = vmatmul.msk.f32.gmra.mxu3 %vm207_vm10, %v189_v47  ;;  %1963 = vmatmul.msk.f32.gmra.mxu1 %vm207_vm10, %v189_v47 }
 0x169   :  { %1953 = vmatmul.msk.f32.gmra.mxu3 %vm207_vm10, %v192_v53  ;;  %1964 = vmatmul.msk.f32.gmra.mxu1 %vm207_vm10, %v192_v53 }
 0x171   :  { %1954 = vmatmul.msk.f32.gmra.mxu3 %vm207_vm10, %v195_v56  ;;  %1965 = vmatmul.msk.f32.gmra.mxu1 %vm207_vm10, %v195_v56 }
 0x179   :  { %1955 = vmatmul.msk.f32.gmra.mxu3 %vm207_vm10, %v198_v59  ;;  %1966 = vmatmul.msk.f32.gmra.mxu1 %vm207_vm10, %v198_v59 }
 0x17e   :  { %v249_v6 = vpop.f32.mrf.mxu1  ;;  %v307_v7 = vpop.f32.mrf.mxu0 }
 0x17f   :  { %v250_v8 = vadd.f32 %v2065_v4, %v249_v6  ;;  %v308_v9 = vadd.f32 %v2609_v5, %v307_v7 }
 0x181   :  { %274 = vst.msk [vmem:[#allocation2] sm:$0xff] %vm273_vm11, %v250_v8  ;;  %1979 = vmatmul.msk.f32.vlgmr.msra.gmra.mxu1 %vm273_vm11, %v2498_v55  ;;  %1980 = vmatmul.msk.f32.vlgmr.msra.gmra.mxu3 %vm273_vm11, %v2498_v55 }
 0x182   :  { %332 = vst.msk [vmem:[#allocation2 + $0x40] sm:$0xff] %vm273_vm11, %v308_v9  ;;  %695 = vmatpush.msra.mxu3 %v2461_v48  ;;  %1518 = vmatpush.msra.mxu1 %v2568_v0 }
 0x184   :  { %696 = vmatpush.msra.mxu3 %v2466_v49  ;;  %1519 = vmatpush.msra.mxu1 %v2573_v1 }
 0x186   :  { %v252_v10 = vpop.f32.mrf.mxu1  ;;  %v310_v11 = vpop.f32.mrf.mxu0  ;;  %697 = vmatpush.msra.mxu3 %v2478_v51  ;;  %1520 = vmatpush.msra.mxu1 %v2583_v2 }
 0x187   :  { %v253_v12 = vadd.f32 %v2065_v4, %v252_v10  ;;  %v311_v13 = vadd.f32 %v2609_v5, %v310_v11 }
 0x188   :  { %698 = vmatpush.msra.mxu3 %v2493_v54  ;;  %1521 = vmatpush.msra.mxu1 %v2591_v3 }
 0x189   :  { %275 = vst.msk [vmem:[#allocation2 + $0x8] sm:$0xff] %vm273_vm11, %v253_v12  ;;  %1982 = vmatmul.msk.f32.vlgmr.msrb.gmra.mxu3 %vm273_vm11, %v2498_v55 }
 0x18a   :  { %333 = vst.msk [vmem:[#allocation2 + $0x48] sm:$0xff] %vm273_vm11, %v311_v13  ;;  %832 = vmatpush.msrb.mxu3 %v2486_v52 }
 0x18c   :  { %833 = vmatpush.msrb.mxu3 %v2510_v57 }
 0x18e   :  { %v255_v14 = vpop.f32.mrf.mxu1  ;;  %834 = vmatpush.msrb.mxu3 %v2528_v60 }
 0x18f   :  { %v256_v15 = vadd.f32 %v2065_v4, %v255_v14 }
 0x190   :  { %835 = vmatpush.msrb.mxu3 %v2546_v62 }
 0x191   :  { %276 = vst.msk [vmem:[#allocation2 + $0x10] sm:$0xff] %vm273_vm11, %v256_v15 }
 0x194   :  { %v313_v16 = vpop.f32.mrf.mxu2 }
 0x195   :  { %v314_v17 = vadd.f32 %v2609_v5, %v313_v16 }
 0x196   :  { %v258_v18 = vpop.f32.mrf.mxu1 }
 0x197   :  { %334 = vst.msk [vmem:[#allocation2 + $0x50] sm:$0xff] %vm273_vm11, %v314_v17  ;;  %v259_v20 = vadd.f32 %v2065_v4, %v258_v18 }
 0x199   :  { %277 = vst.msk [vmem:[#allocation2 + $0x18] sm:$0xff] %vm273_vm11, %v259_v20 }
 0x19c   :  { %v316_v21 = vpop.f32.mrf.mxu2 }
 0x19d   :  { %v317_v22 = vadd.f32 %v2609_v5, %v316_v21 }
 0x19e   :  { %v261_v23 = vpop.f32.mrf.mxu1 }
 0x19f   :  { %335 = vst.msk [vmem:[#allocation2 + $0x58] sm:$0xff] %vm273_vm11, %v317_v22  ;;  %v262_v24 = vadd.f32 %v2065_v4, %v261_v23 }
 0x1a1   :  { %278 = vst.msk [vmem:[#allocation2 + $0x20] sm:$0xff] %vm273_vm11, %v262_v24 }
 0x1a4   :  { %v319_v25 = vpop.f32.mrf.mxu2 }
 0x1a5   :  { %v320_v26 = vadd.f32 %v2609_v5, %v319_v25 }
 0x1a6   :  { %v264_v27 = vpop.f32.mrf.mxu1 }
 0x1a7   :  { %336 = vst.msk [vmem:[#allocation2 + $0x60] sm:$0xff] %vm273_vm11, %v320_v26  ;;  %v265_v28 = vadd.f32 %v2065_v4, %v264_v27  ;;  %v477_v26 = vld [vmem:[#allocation2] sm:$0xff] }
 0x1a9   :  { %279 = vst.msk [vmem:[#allocation2 + $0x28] sm:$0xff] %vm273_vm11, %v265_v28 }
 0x1ac   :  { %v322_v29 = vpop.f32.mrf.mxu3 }
 0x1ad   :  { %v323_v30 = vadd.f32 %v2609_v5, %v322_v29 }
 0x1ae   :  { %v267_v31 = vpop.f32.mrf.mxu1 }
 0x1af   :  { %337 = vst.msk [vmem:[#allocation2 + $0x68] sm:$0xff] %vm273_vm11, %v323_v30  ;;  %v268_v32 = vadd.f32 %v2065_v4, %v267_v31  ;;  %v502_v30 = vld [vmem:[#allocation2 + $0x40] sm:$0xff] }
 0x1b1   :  { %280 = vst.msk [vmem:[#allocation2 + $0x30] sm:$0xff] %vm273_vm11, %v268_v32 }
 0x1b4   :  { %v325_v33 = vpop.f32.mrf.mxu3 }
 0x1b5   :  { %v326_v34 = vadd.f32 %v2609_v5, %v325_v33 }
 0x1b6   :  { %v270_v35 = vpop.f32.mrf.mxu1 }
 0x1b7   :  { %338 = vst.msk [vmem:[#allocation2 + $0x70] sm:$0xff] %vm273_vm11, %v326_v34  ;;  %v271_v36 = vadd.f32 %v2065_v4, %v270_v35 }
 0x1b9   :  { %281 = vst.msk [vmem:[#allocation2 + $0x38] sm:$0xff] %vm273_vm11, %v271_v36 }
 0x1bc   :  { %v328_v38 = vpop.f32.mrf.mxu3 }
 0x1bd   :  { %v329_v39 = vadd.f32 %v2609_v5, %v328_v38 }
 0x1be   :  { %v423_v40 = vpop.f32.mrf.mxu1 }
 0x1bf   :  { %339 = vst.msk [vmem:[#allocation2 + $0x78] sm:$0xff] %vm273_vm11, %v329_v39  ;;  %v424_v41 = vadd.f32 %v2067_v37, %v423_v40 }
 0x1c1   :  { %448 = vst.msk [vmem:[#allocation2 + $0xc0] sm:$0xff] %vm273_vm11, %v424_v41 }
 0x1c4   :  { %v365_v43 = vpop.f32.mrf.mxu3 }
 0x1c5   :  { %v366_v44 = vadd.f32 %v2068_v42, %v365_v43 }
 0x1c6   :  { %v426_v45 = vpop.f32.mrf.mxu1 }
 0x1c7   :  { %390 = vst.msk [vmem:[#allocation2 + $0x80] sm:$0xff] %vm273_vm11, %v366_v44  ;;  %v427_v46 = vadd.f32 %v2067_v37, %v426_v45  ;;  %v542_v45 = vpop.f32.mrf.mxu2 }
 0x1c8   :  { %v546_v36 = vld [vmem:[#allocation2 + $0xc0] sm:$0xff] }
 0x1c9   :  { %449 = vst.msk [vmem:[#allocation2 + $0xc8] sm:$0xff] %vm273_vm11, %v427_v46 }
 0x1cc   :  { %v368_v47 = vpop.f32.mrf.mxu3 }
 0x1cd   :  { %v369_v53 = vadd.f32 %v2068_v42, %v368_v47 }
 0x1ce   :  { %v429_v55 = vpop.f32.mrf.mxu1  ;;  %v524_v44 = vld [vmem:[#allocation2 + $0x80] sm:$0xff] }
 0x1cf   :  { %391 = vst.msk [vmem:[#allocation2 + $0x88] sm:$0xff] %vm273_vm11, %v369_v53  ;;  %v430_v56 = vadd.f32 %v2067_v37, %v429_v55 }
 0x1d1   :  { %450 = vst.msk [vmem:[#allocation2 + $0xd0] sm:$0xff] %vm273_vm11, %v430_v56  ;;  %v545_v56 = vadd.f32 %v542_v45, %v524_v44  ;;  %v705_v44 = vld [vmem:[#allocation2 + $0xc8] sm:$0xff] }
 0x1d4   :  { %v371_v59 = vpop.f32.mrf.mxu3 }
 0x1d5   :  { %v372_v4 = vadd.f32 %v2068_v42, %v371_v59 }
 0x1d6   :  { %v432_v5 = vpop.f32.mrf.mxu1 }
 0x1d7   :  { %392 = vst.msk [vmem:[#allocation2 + $0x90] sm:$0xff] %vm273_vm11, %v372_v4  ;;  %v433_v6 = vadd.f32 %v2067_v37, %v432_v5 }
 0x1d9   :  { %451 = vst.msk [vmem:[#allocation2 + $0xd8] sm:$0xff] %vm273_vm11, %v433_v6 }
 0x1dc   :  { %v374_v7 = vpop.f32.mrf.mxu3 }
 0x1dd   :  { %v375_v8 = vadd.f32 %v2068_v42, %v374_v7 }
 0x1de   :  { %v435_v9 = vpop.f32.mrf.mxu1 }
 0x1df   :  { %393 = vst.msk [vmem:[#allocation2 + $0x98] sm:$0xff] %vm273_vm11, %v375_v8  ;;  %v436_v10 = vadd.f32 %v2067_v37, %v435_v9 }
 0x1e1   :  { %452 = vst.msk [vmem:[#allocation2 + $0xe0] sm:$0xff] %vm273_vm11, %v436_v10 }
 0x1e4   :  { %v377_v11 = vpop.f32.mrf.mxu3 }
 0x1e5   :  { %v378_v12 = vadd.f32 %v2068_v42, %v377_v11 }
 0x1e6   :  { %v438_v13 = vpop.f32.mrf.mxu1 }
 0x1e7   :  { %394 = vst.msk [vmem:[#allocation2 + $0xa0] sm:$0xff] %vm273_vm11, %v378_v12  ;;  %v439_v14 = vadd.f32 %v2067_v37, %v438_v13 }
 0x1e9   :  { %453 = vst.msk [vmem:[#allocation2 + $0xe8] sm:$0xff] %vm273_vm11, %v439_v14 }
 0x1ec   :  { %v380_v15 = vpop.f32.mrf.mxu3 }
 0x1ed   :  { %v381_v16 = vadd.f32 %v2068_v42, %v380_v15 }
 0x1ee   :  { %v441_v17 = vpop.f32.mrf.mxu1 }
 0x1ef   :  { %395 = vst.msk [vmem:[#allocation2 + $0xa8] sm:$0xff] %vm273_vm11, %v381_v16  ;;  %v442_v18 = vadd.f32 %v2067_v37, %v441_v17  ;;  %v476_v17 = vld [vmem:[#allocation4] sm:$0xff] }
 0x1f1   :  { %454 = vst.msk [vmem:[#allocation2 + $0xf0] sm:$0xff] %vm273_vm11, %v442_v18 }
 0x1f4   :  { %v383_v20 = vpop.f32.mrf.mxu3 }
 0x1f5   :  { %v384_v21 = vadd.f32 %v2068_v42, %v383_v20 }
 0x1f6   :  { %v444_v22 = vpop.f32.mrf.mxu1 }
 0x1f7   :  { %396 = vst.msk [vmem:[#allocation2 + $0xb0] sm:$0xff] %vm273_vm11, %v384_v21  ;;  %v445_v23 = vadd.f32 %v2067_v37, %v444_v22 }
 0x1f9   :  { %455 = vst.msk [vmem:[#allocation2 + $0xf8] sm:$0xff] %vm273_vm11, %v445_v23 }
 0x1fc   :  { %v386_v24 = vpop.f32.mrf.mxu3 }
 0x1fd   :  { %v387_v25 = vadd.f32 %v2068_v42, %v386_v24 }
 0x1fe   :  { %v498_v27 = vpop.f32.mrf.mxu1 }
 0x1ff   :  { %397 = vst.msk [vmem:[#allocation2 + $0xb8] sm:$0xff] %vm273_vm11, %v387_v25  ;;  %v501_v28 = vadd.f32 %v498_v27, %v477_v26 }
 0x201   :  { %v1983_v29 = vmul.f32 -1.442695, %v501_v28 }
 0x203   :  { %2070 = vpow2.f32 %v1983_v29 }
 0x204   :  { %v520_v31 = vpop.f32.mrf.mxu3 }
 0x205   :  { %v523_v32 = vadd.f32 %v520_v31, %v502_v30 }
 0x207   :  { %v1984_v33 = vmul.f32 -1.442695, %v523_v32 }
 0x209   :  { %v2071_v34 = vpop.eup %2070  ;;  %2072 = vpow2.f32 %v1984_v33 }
 0x20a   :  { %v571_v35 = vadd.f32 1.0, %v2071_v34 }
 0x20c   :  { %2074 = vrcp.f32 %v571_v35  ;;  %v564_v37 = vpop.f32.mrf.mxu3  ;;  %v583_v6 = vand.u32 2147483648, %v571_v35  ;;  %vm577_vm13 = vweird.f32 %v571_v35  ;;  %v581_v7 = vand.u32 2147483647, %v571_v35 }
 0x20d   :  { %v567_v38 = vadd.f32 %v564_v37, %v546_v36  ;;  %v633_v37 = vld [vmem:[#allocation2 + $0x8] sm:$0xff] }
 0x20e   :  { %v584_v13 = vor.u32 1.1754944e-38, %v583_v6  ;;  %vm582_vm0 = vcmp.eq.f32.partialorder %v581_v7, 8.507059e+37 }
 0x20f   :  { %v2073_v39 = vpop.eup %2072  ;;  %v1985_v40 = vmul.f32 -1.442695, %v567_v38 }
 0x210   :  { %v590_v41 = vadd.f32 1.0, %v2073_v39 }
 0x211   :  { %2076 = vpow2.f32 %v1985_v40 }
 0x212   :  { %v2075_v42 = vpop.eup %2074  ;;  %2078 = vrcp.f32 %v590_v41  ;;  %v602_v9 = vand.u32 2147483648, %v590_v41  ;;  %v600_v12 = vand.u32 2147483647, %v590_v41  ;;  %vm596_vm1 = vweird.f32 %v590_v41 }
 0x213   :  { %v573_v43 = vmul.f32 %v2075_v42, %v571_v35  ;;  %vm578_vm12 = vweird.f32 %v2075_v42 }
 0x214   :  { %vm579_vm14 = vmor %vm577_vm13, %vm578_vm12  ;;  %v603_v18 = vor.u32 1.1754944e-38, %v602_v9  ;;  %vm601_vm3 = vcmp.eq.f32.partialorder %v600_v12, 8.507059e+37 }
 0x215   :  { %v574_v46 = vsub.f32 1.0, %v573_v43 }
 0x217   :  { %v2077_v47 = vpop.eup %2076  ;;  %v575_v53 = vmul.f32 %v2075_v42, %v574_v46 }
 0x218   :  { %v2079_v55 = vpop.eup %2078  ;;  %v610_v59 = vadd.f32 1.0, %v2077_v47 }
 0x219   :  { %v576_v4 = vadd.f32 %v2075_v42, %v575_v53  ;;  %v592_v5 = vmul.f32 %v2079_v55, %v590_v41  ;;  %vm597_vm15 = vweird.f32 %v2079_v55  ;;  %v659_v41 = vld [vmem:[#allocation2 + $0x48] sm:$0xff] }
 0x21a   :  { %2080 = vrcp.f32 %v610_v59  ;;  %vm598_vm2 = vmor %vm596_vm1, %vm597_vm15  ;;  %v622_v29 = vand.u32 2147483648, %v610_v59  ;;  %vm616_vm5 = vweird.f32 %v610_v59  ;;  %v620_v31 = vand.u32 2147483647, %v610_v59 }
 0x21b   :  { %v593_v8 = vsub.f32 1.0, %v592_v5  ;;  %2082 = vtanh.f32 %v545_v56  ;;  %v580_v10 = vsel %vm579_vm14, %v2075_v42, %v576_v4 }
 0x21c   :  { %v585_v16 = vsel %vm582_vm0, %v584_v13, %v580_v10  ;;  %v623_v33 = vor.u32 1.1754944e-38, %v622_v29  ;;  %vm621_vm7 = vcmp.eq.f32.partialorder %v620_v31, 8.507059e+37 }
 0x21d   :  { %v594_v11 = vmul.f32 %v2079_v55, %v593_v8 }
 0x21f   :  { %v595_v14 = vadd.f32 %v2079_v55, %v594_v11  ;;  %v682_v11 = vld [vmem:[#allocation2 + $0x88] sm:$0xff] }
 0x220   :  { %v2081_v15 = vpop.eup %2080 }
 0x221   :  { %v599_v20 = vsel %vm598_vm2, %v2079_v55, %v595_v14  ;;  %v612_v21 = vmul.f32 %v2081_v15, %v610_v59  ;;  %v2083_v22 = vpop.eup %2082  ;;  %vm617_vm4 = vweird.f32 %v2081_v15 }
 0x222   :  { %v604_v23 = vsel %vm601_vm3, %v603_v18, %v599_v20  ;;  %v627_v24 = vmul.f32 %v2083_v22, %v585_v16  ;;  %vm618_vm6 = vmor %vm616_vm5, %vm617_vm4 }
 0x223   :  { %v626_v25 = vmul.f32 %v604_v23, %v476_v17  ;;  %v613_v26 = vsub.f32 1.0, %v612_v21 }
 0x225   :  { %v614_v27 = vmul.f32 %v2081_v15, %v613_v26  ;;  %v2675_v28 = vadd.f32 %v627_v24, %v626_v25 }
 0x227   :  { %v615_v30 = vadd.f32 %v2081_v15, %v614_v27  ;;  %2084 = vtanh.f32 %v2675_v28 }
 0x229   :  { %v619_v32 = vsel %vm618_vm6, %v2081_v15, %v615_v30 }
 0x22a   :  { %v624_v35 = vsel %vm621_vm7, %v623_v33, %v619_v32 }
 0x22d   :  { %v2085_v34 = vpop.eup %2084 }
 0x22e   :  { %v630_v36 = vmul.f32 %v2085_v34, %v624_v35 }
 0x230   :  { %631 = vst.msk [vmem:[#allocation3] sm:$0xff] %vm273_vm11, %v630_v36  ;;  %1986 = vmatmul.msk.f32.vlgmr.msra.gmra.mxu0 %vm273_vm11, %v630_v36  ;;  %1987 = vmatmul.msk.f32.vlgmr.msra.gmra.mxu2 %vm273_vm11, %v630_v36 }
 0x231   :  { %1988 = vmatmul.msk.f32.vlgmr.msra.gmra.mxu3 %vm273_vm11, %v630_v36  ;;  %855 = vmatpush.msra.mxu0 %v2461_v48 }
 0x232   :  { %878 = vmatpush.msra.mxu2 %v2568_v0  ;;  %969 = vmatpush.msra.mxu3 %v2472_v50 }
 0x233   :  { %856 = vmatpush.msra.mxu0 %v2466_v49 }
 0x234   :  { %879 = vmatpush.msra.mxu2 %v2573_v1  ;;  %970 = vmatpush.msra.mxu3 %v2515_v58 }
 0x235   :  { %857 = vmatpush.msra.mxu0 %v2478_v51 }
 0x236   :  { %880 = vmatpush.msra.mxu2 %v2583_v2  ;;  %971 = vmatpush.msra.mxu3 %v2533_v61 }
 0x237   :  { %858 = vmatpush.msra.mxu0 %v2493_v54 }
 0x238   :  { %1989 = vmatmul.msk.f32.vlgmr.msrb.gmra.mxu0 %vm273_vm11, %v630_v36  ;;  %881 = vmatpush.msra.mxu2 %v2591_v3 }
 0x239   :  { %992 = vmatpush.msrb.mxu0 %v2486_v52  ;;  %972 = vmatpush.msra.mxu3 %v2551_v63 }
 0x23b   :  { %993 = vmatpush.msrb.mxu0 %v2510_v57 }
 0x23d   :  { %994 = vmatpush.msrb.mxu0 %v2528_v60 }
 0x23f   :  { %995 = vmatpush.msrb.mxu0 %v2546_v62 }
 0x2ad   :  { %v654_v38 = vpop.f32.mrf.mxu0 }
 0x2ae   :  { %v657_v39 = vadd.f32 %v654_v38, %v633_v37 }
 0x2b0   :  { %v1990_v40 = vmul.f32 -1.442695, %v657_v39 }
 0x2b2   :  { %2086 = vpow2.f32 %v1990_v40 }
 0x2b3   :  { %v677_v42 = vpop.f32.mrf.mxu2 }
 0x2b4   :  { %v680_v43 = vadd.f32 %v677_v42, %v659_v41  ;;  %v700_v10 = vpop.f32.mrf.mxu3 }
 0x2b5   :  { %v723_v45 = vpop.f32.mrf.mxu0  ;;  %v703_v14 = vadd.f32 %v700_v10, %v682_v11 }
 0x2b6   :  { %v1991_v46 = vmul.f32 -1.442695, %v680_v43  ;;  %v726_v47 = vadd.f32 %v723_v45, %v705_v44 }
 0x2b8   :  { %v2087_v53 = vpop.eup %2086  ;;  %2088 = vpow2.f32 %v1991_v46  ;;  %v1992_v55 = vmul.f32 -1.442695, %v726_v47 }
 0x2b9   :  { %v730_v56 = vadd.f32 1.0, %v2087_v53 }
 0x2ba   :  { %2090 = vpow2.f32 %v1992_v55  ;;  %v819_v55 = vld [vmem:[#allocation2 + $0x50] sm:$0xff] }
 0x2bb   :  { %2092 = vrcp.f32 %v730_v56  ;;  %v742_v17 = vand.u32 2147483648, %v730_v56  ;;  %vm736_vm9 = vweird.f32 %v730_v56  ;;  %v740_v21 = vand.u32 2147483647, %v730_v56 }
 0x2bd   :  { %v743_v27 = vor.u32 1.1754944e-38, %v742_v17  ;;  %vm741_vm14 = vcmp.eq.f32.partialorder %v740_v21, 8.507059e+37  ;;  %v842_v17 = vld [vmem:[#allocation2 + $0x90] sm:$0xff] }
 0x2be   :  { %v2089_v59 = vpop.eup %2088 }
 0x2bf   :  { %v749_v4 = vadd.f32 1.0, %v2089_v59 }
 0x2c0   :  { %v2091_v5 = vpop.eup %2090 }
 0x2c1   :  { %v2093_v6 = vpop.eup %2092  ;;  %2094 = vrcp.f32 %v749_v4  ;;  %v769_v8 = vadd.f32 1.0, %v2091_v5  ;;  %v761_v22 = vand.u32 2147483648, %v749_v4  ;;  %v759_v26 = vand.u32 2147483647, %v749_v4 }
 0x2c2   :  { %v732_v7 = vmul.f32 %v2093_v6, %v730_v56  ;;  %vm737_vm8 = vweird.f32 %v2093_v6  ;;  %vm755_vm13 = vweird.f32 %v749_v4 }
 0x2c3   :  { %2096 = vrcp.f32 %v769_v8  ;;  %vm738_vm10 = vmor %vm736_vm9, %vm737_vm8  ;;  %v762_v31 = vor.u32 1.1754944e-38, %v761_v22  ;;  %vm760_vm0 = vcmp.eq.f32.partialorder %v759_v26, 8.507059e+37  ;;  %v781_v41 = vand.u32 2147483648, %v769_v8 }
 0x2c4   :  { %v733_v9 = vsub.f32 1.0, %v732_v7  ;;  %2098 = vtanh.f32 %v703_v14  ;;  %vm775_vm2 = vweird.f32 %v769_v8  ;;  %v779_v42 = vand.u32 2147483647, %v769_v8  ;;  %v865_v7 = vld [vmem:[#allocation2 + $0xd0] sm:$0xff] }
 0x2c5   :  { %v782_v44 = vor.u32 1.1754944e-38, %v781_v41 }
 0x2c6   :  { %v734_v12 = vmul.f32 %v2093_v6, %v733_v9  ;;  %vm780_vm4 = vcmp.eq.f32.partialorder %v779_v42, 8.507059e+37 }
 0x2c7   :  { %v2095_v13 = vpop.eup %2094 }
 0x2c8   :  { %v751_v15 = vmul.f32 %v2095_v13, %v749_v4  ;;  %v735_v16 = vadd.f32 %v2093_v6, %v734_v12  ;;  %vm756_vm12 = vweird.f32 %v2095_v13 }
 0x2c9   :  { %v2097_v18 = vpop.eup %2096  ;;  %vm757_vm15 = vmor %vm755_vm13, %vm756_vm12 }
 0x2ca   :  { %v752_v20 = vsub.f32 1.0, %v751_v15  ;;  %v771_v23 = vmul.f32 %v2097_v18, %v769_v8  ;;  %v739_v25 = vsel %vm738_vm10, %v2093_v6, %v735_v16  ;;  %v2099_v34 = vpop.eup %2098  ;;  %vm776_vm1 = vweird.f32 %v2097_v18 }
 0x2cb   :  { %v744_v32 = vsel %vm741_vm14, %v743_v27, %v739_v25  ;;  %vm777_vm3 = vmor %vm775_vm2, %vm776_vm1 }
 0x2cc   :  { %v753_v24 = vmul.f32 %v2095_v13, %v752_v20  ;;  %v772_v29 = vsub.f32 1.0, %v771_v23  ;;  %v786_v38 = vmul.f32 %v2099_v34, %v744_v32 }
 0x2ce   :  { %v754_v30 = vadd.f32 %v2095_v13, %v753_v24  ;;  %v773_v36 = vmul.f32 %v2097_v18, %v772_v29 }
 0x2d0   :  { %v758_v33 = vsel %vm757_vm15, %v2095_v13, %v754_v30  ;;  %v774_v40 = vadd.f32 %v2097_v18, %v773_v36 }
 0x2d1   :  { %v763_v35 = vsel %vm760_vm0, %v762_v31, %v758_v33 }
 0x2d2   :  { %v785_v37 = vmul.f32 %v763_v35, %v2675_v28  ;;  %v778_v43 = vsel %vm777_vm3, %v2097_v18, %v774_v40  ;;  %v793_v28 = vld [vmem:[#allocation2 + $0x10] sm:$0xff] }
 0x2d3   :  { %v783_v46 = vsel %vm780_vm4, %v782_v44, %v778_v43 }
 0x2d4   :  { %v2700_v39 = vadd.f32 %v786_v38, %v785_v37 }
 0x2d6   :  { %2100 = vtanh.f32 %v2700_v39 }
 0x2dc   :  { %v2101_v45 = vpop.eup %2100 }
 0x2dd   :  { %v789_v47 = vmul.f32 %v2101_v45, %v783_v46 }
 0x2df   :  { %791 = vst.msk [vmem:[#allocation3 + $0x8] sm:$0xff] %vm273_vm11, %v789_v47  ;;  %1993 = vmatmul.msk.f32.vlgmr.msrb.gmra.mxu2 %vm273_vm11, %v789_v47  ;;  %1994 = vmatmul.msk.f32.vlgmr.msrb.gmra.mxu3 %vm273_vm11, %v789_v47 }
 0x2e0   :  { %1995 = vmatmul.msk.f32.vlgmr.msra.gmra.mxu0 %vm273_vm11, %v789_v47  ;;  %1015 = vmatpush.msrb.mxu2 %v2461_v48 }
 0x2e1   :  { %1038 = vmatpush.msrb.mxu3 %v2568_v0  ;;  %1129 = vmatpush.msra.mxu0 %v2472_v50 }
 0x2e2   :  { %1016 = vmatpush.msrb.mxu2 %v2466_v49 }
 0x2e3   :  { %1039 = vmatpush.msrb.mxu3 %v2573_v1  ;;  %1130 = vmatpush.msra.mxu0 %v2515_v58 }
 0x2e4   :  { %1017 = vmatpush.msrb.mxu2 %v2478_v51 }
 0x2e5   :  { %1040 = vmatpush.msrb.mxu3 %v2583_v2  ;;  %1131 = vmatpush.msra.mxu0 %v2533_v61 }
 0x2e6   :  { %1018 = vmatpush.msrb.mxu2 %v2493_v54 }
 0x2e7   :  { %1996 = vmatmul.msk.f32.vlgmr.msra.gmra.mxu2 %vm273_vm11, %v789_v47  ;;  %1041 = vmatpush.msrb.mxu3 %v2591_v3 }
 0x2e8   :  { %1152 = vmatpush.msra.mxu2 %v2486_v52  ;;  %1132 = vmatpush.msra.mxu0 %v2551_v63 }
 0x2ea   :  { %1153 = vmatpush.msra.mxu2 %v2510_v57 }
 0x2ec   :  { %1154 = vmatpush.msra.mxu2 %v2528_v60 }
 0x2ee   :  { %1155 = vmatpush.msra.mxu2 %v2546_v62 }
 0x35d   :  { %v860_v15 = vpop.f32.mrf.mxu0 }
 0x35e   :  { %v863_v20 = vadd.f32 %v860_v15, %v842_v17  ;;  %v1002_v15 = vld [vmem:[#allocation2 + $0x98] sm:$0xff] }
 0x362   :  { %v814_v53 = vpop.f32.mrf.mxu2  ;;  %v837_v56 = vpop.f32.mrf.mxu3 }
 0x363   :  { %v817_v59 = vadd.f32 %v814_v53, %v793_v28  ;;  %v840_v4 = vadd.f32 %v837_v56, %v819_v55 }
 0x365   :  { %v1997_v5 = vmul.f32 -1.442695, %v817_v59  ;;  %v1998_v6 = vmul.f32 -1.442695, %v840_v4 }
 0x367   :  { %2102 = vpow2.f32 %v1997_v5 }
 0x368   :  { %2104 = vpow2.f32 %v1998_v6 }
 0x36a   :  { %v883_v8 = vpop.f32.mrf.mxu2 }
 0x36b   :  { %v886_v9 = vadd.f32 %v883_v8, %v865_v7 }
 0x36d   :  { %v2103_v10 = vpop.eup %2102  ;;  %v1999_v11 = vmul.f32 -1.442695, %v886_v9 }
 0x36e   :  { %v2105_v12 = vpop.eup %2104  ;;  %v890_v13 = vadd.f32 1.0, %v2103_v10 }
 0x36f   :  { %v909_v14 = vadd.f32 1.0, %v2105_v12  ;;  %2106 = vpow2.f32 %v1999_v11 }
 0x370   :  { %2108 = vrcp.f32 %v890_v13  ;;  %v902_v26 = vand.u32 2147483648, %v890_v13  ;;  %v900_v30 = vand.u32 2147483647, %v890_v13  ;;  %vm896_vm7 = vweird.f32 %v890_v13 }
 0x371   :  { %2110 = vrcp.f32 %v909_v14  ;;  %v921_v31 = vand.u32 2147483648, %v909_v14  ;;  %v919_v33 = vand.u32 2147483647, %v909_v14  ;;  %vm915_vm9 = vweird.f32 %v909_v14 }
 0x372   :  { %v903_v36 = vor.u32 1.1754944e-38, %v902_v26  ;;  %vm901_vm10 = vcmp.eq.f32.partialorder %v900_v30, 8.507059e+37 }
 0x373   :  { %v922_v40 = vor.u32 1.1754944e-38, %v921_v31  ;;  %vm920_vm13 = vcmp.eq.f32.partialorder %v919_v33, 8.507059e+37 }
 0x375   :  { %v2107_v16 = vpop.eup %2106 }
 0x376   :  { %v2109_v18 = vpop.eup %2108  ;;  %v929_v21 = vadd.f32 1.0, %v2107_v16 }
 0x377   :  { %v2111_v22 = vpop.eup %2110  ;;  %v892_v23 = vmul.f32 %v2109_v18, %v890_v13  ;;  %vm897_vm5 = vweird.f32 %v2109_v18 }
 0x378   :  { %v911_v24 = vmul.f32 %v2111_v22, %v909_v14  ;;  %2112 = vrcp.f32 %v929_v21  ;;  %vm916_vm6 = vweird.f32 %v2111_v22  ;;  %vm898_vm8 = vmor %vm896_vm7, %vm897_vm5  ;;  %v941_v59 = vand.u32 2147483648, %v929_v21 }
 0x379   :  { %v893_v25 = vsub.f32 1.0, %v892_v23  ;;  %2114 = vtanh.f32 %v863_v20  ;;  %vm917_vm12 = vmor %vm915_vm9, %vm916_vm6  ;;  %vm935_vm15 = vweird.f32 %v929_v21  ;;  %v939_v4 = vand.u32 2147483647, %v929_v21 }
 0x37a   :  { %v912_v27 = vsub.f32 1.0, %v911_v24  ;;  %v942_v6 = vor.u32 1.1754944e-38, %v941_v59 }
 0x37b   :  { %v894_v29 = vmul.f32 %v2109_v18, %v893_v25  ;;  %vm940_vm1 = vcmp.eq.f32.partialorder %v939_v4, 8.507059e+37 }
 0x37c   :  { %v913_v32 = vmul.f32 %v2111_v22, %v912_v27 }
 0x37d   :  { %v895_v34 = vadd.f32 %v2109_v18, %v894_v29 }
 0x37e   :  { %v2113_v35 = vpop.eup %2112  ;;  %v914_v37 = vadd.f32 %v2111_v22, %v913_v32 }
 0x37f   :  { %v899_v38 = vsel %vm898_vm8, %v2109_v18, %v895_v34  ;;  %v931_v41 = vmul.f32 %v2113_v35, %v929_v21  ;;  %v2115_v42 = vpop.eup %2114  ;;  %vm936_vm14 = vweird.f32 %v2113_v35 }
 0x380   :  { %v904_v43 = vsel %vm901_vm10, %v903_v36, %v899_v38  ;;  %v918_v44 = vsel %vm917_vm12, %v2111_v22, %v914_v37  ;;  %vm937_vm0 = vmor %vm935_vm15, %vm936_vm14 }
 0x381   :  { %v946_v45 = vmul.f32 %v2115_v42, %v904_v43  ;;  %v923_v46 = vsel %vm920_vm13, %v922_v40, %v918_v44  ;;  %v932_v47 = vsub.f32 1.0, %v931_v41 }
 0x382   :  { %v945_v28 = vmul.f32 %v923_v46, %v2700_v39 }
 0x383   :  { %v933_v53 = vmul.f32 %v2113_v35, %v932_v47 }
 0x384   :  { %v2725_v55 = vadd.f32 %v946_v45, %v945_v28 }
 0x385   :  { %v934_v56 = vadd.f32 %v2113_v35, %v933_v53 }
 0x386   :  { %2116 = vtanh.f32 %v2725_v55 }
 0x387   :  { %v938_v5 = vsel %vm937_vm0, %v2113_v35, %v934_v56 }
 0x388   :  { %v943_v8 = vsel %vm940_vm1, %v942_v6, %v938_v5  ;;  %v2766_v5 = vld [vmem:[%s2965_s5 + $0x18] sm:$0xff] }
 0x389   :  { %v2772_v6 = vld [vmem:[%s2965_s5 + $0x38] sm:$0xff] }
 0x38c   :  { %v2117_v7 = vpop.eup %2116 }
 0x38d   :  { %v949_v9 = vmul.f32 %v2117_v7, %v943_v8  ;;  %v2778_v7 = vld [vmem:[%s2965_s5 + $0x50] sm:$0xff] }
 0x38e   :  { %v2784_v8 = vld [vmem:[%s2965_s5 + $0x10] sm:$0xff] }
 0x38f   :  { %951 = vst.msk [vmem:[#allocation3 + $0x10] sm:$0xff] %vm273_vm11, %v949_v9  ;;  %2000 = vmatmul.msk.f32.vlgmr.msra.gmra.mxu3 %vm273_vm11, %v949_v9  ;;  %2001 = vmatmul.msk.f32.vlgmr.msrb.gmra.mxu0 %vm273_vm11, %v949_v9 }
 0x390   :  { %2002 = vmatmul.msk.f32.vlgmr.msrb.gmra.mxu2 %vm273_vm11, %v949_v9  ;;  %1175 = vmatpush.msra.mxu3 %v2461_v48  ;;  %v979_v48 = vld [vmem:[#allocation2 + $0x58] sm:$0xff] }
 0x391   :  { %1198 = vmatpush.msrb.mxu0 %v2568_v0  ;;  %1289 = vmatpush.msrb.mxu2 %v2472_v50 }
 0x392   :  { %1176 = vmatpush.msra.mxu3 %v2466_v49 }
 0x393   :  { %1199 = vmatpush.msrb.mxu0 %v2573_v1  ;;  %1290 = vmatpush.msrb.mxu2 %v2515_v58 }
 0x394   :  { %1177 = vmatpush.msra.mxu3 %v2478_v51 }
 0x395   :  { %1200 = vmatpush.msrb.mxu0 %v2583_v2  ;;  %1291 = vmatpush.msrb.mxu2 %v2533_v61 }
 0x396   :  { %1178 = vmatpush.msra.mxu3 %v2493_v54  ;;  %v953_v54 = vld [vmem:[#allocation2 + $0x18] sm:$0xff] }
 0x397   :  { %2003 = vmatmul.msk.f32.vlgmr.msrb.gmra.mxu3 %vm273_vm11, %v949_v9  ;;  %1201 = vmatpush.msrb.mxu0 %v2591_v3  ;;  %v2790_v9 = vld [vmem:[%s2965_s5 + $0x30] sm:$0xff] }
 0x398   :  { %1312 = vmatpush.msrb.mxu3 %v2486_v52  ;;  %1292 = vmatpush.msrb.mxu2 %v2551_v63  ;;  %v1025_v63 = vld [vmem:[#allocation2 + $0xd8] sm:$0xff] }
 0x39a   :  { %1313 = vmatpush.msrb.mxu3 %v2510_v57 }
 0x39c   :  { %1314 = vmatpush.msrb.mxu3 %v2528_v60 }
 0x39e   :  { %1315 = vmatpush.msrb.mxu3 %v2546_v62 }
 0x40c   :  { %v997_v49 = vpop.f32.mrf.mxu0 }
 0x40d   :  { %v1000_v50 = vadd.f32 %v997_v49, %v979_v48  ;;  %v2796_v48 = vld [vmem:[%s2965_s5 + $0x48] sm:$0xff] }
 0x40e   :  { %v2802_v49 = vld [vmem:[%s2965_s5 + $0x8] sm:$0xff] }
 0x40f   :  { %v2005_v51 = vmul.f32 -1.442695, %v1000_v50  ;;  %v2808_v50 = vld [vmem:[%s2965_s5 + $0x28] sm:$0xff] }
 0x411   :  { %2118 = vpow2.f32 %v2005_v51  ;;  %v2814_v51 = vld [vmem:[%s2965_s5 + $0x40] sm:$0xff] }
 0x412   :  { %v974_v58 = vpop.f32.mrf.mxu3 }
 0x413   :  { %v977_v61 = vadd.f32 %v974_v58, %v953_v54  ;;  %v1020_v12 = vpop.f32.mrf.mxu2  ;;  %v2821_v54 = vld [vmem:[%s2965_s5] sm:$0xff] }
 0x414   :  { %v1023_v17 = vadd.f32 %v1020_v12, %v1002_v15  ;;  %v2828_v58 = vld [vmem:[%s2965_s5 + $0x20] sm:$0xff] }
 0x415   :  { %v2004_v0 = vmul.f32 -1.442695, %v977_v61  ;;  %v1113_v61 = vld [vmem:[#allocation2 + $0x20] sm:$0xff] }
 0x417   :  { %v2119_v1 = vpop.eup %2118  ;;  %2120 = vpow2.f32 %v2004_v0 }
 0x418   :  { %v1069_v52 = vadd.f32 1.0, %v2119_v1 }
 0x41a   :  { %2122 = vrcp.f32 %v1069_v52  ;;  %v1043_v2 = vpop.f32.mrf.mxu3  ;;  %v1081_v22 = vand.u32 2147483648, %v1069_v52  ;;  %vm1075_vm3 = vweird.f32 %v1069_v52  ;;  %v1079_v24 = vand.u32 2147483647, %v1069_v52 }
 0x41b   :  { %v1046_v57 = vadd.f32 %v1043_v2, %v1025_v63  ;;  %v1139_v63 = vld [vmem:[#allocation2 + $0x60] sm:$0xff] }
 0x41c   :  { %v1082_v30 = vor.u32 1.1754944e-38, %v1081_v22  ;;  %vm1080_vm7 = vcmp.eq.f32.partialorder %v1079_v24, 8.507059e+37  ;;  %v1162_v22 = vld [vmem:[#allocation2 + $0xa0] sm:$0xff] }
 0x41d   :  { %v2121_v3 = vpop.eup %2120  ;;  %v2006_v60 = vmul.f32 -1.442695, %v1046_v57 }
 0x41e   :  { %v1050_v39 = vadd.f32 1.0, %v2121_v3  ;;  %v1185_v3 = vld [vmem:[#allocation2 + $0xe0] sm:$0xff] }
 0x41f   :  { %2124 = vpow2.f32 %v2006_v60 }
 0x420   :  { %v2123_v62 = vpop.eup %2122  ;;  %2126 = vrcp.f32 %v1050_v39  ;;  %v1062_v25 = vand.u32 2147483648, %v1050_v39  ;;  %v1060_v27 = vand.u32 2147483647, %v1050_v39  ;;  %vm1056_vm6 = vweird.f32 %v1050_v39 }
 0x421   :  { %v1071_v10 = vmul.f32 %v2123_v62, %v1069_v52  ;;  %vm1076_vm2 = vweird.f32 %v2123_v62 }
 0x422   :  { %vm1077_vm4 = vmor %vm1075_vm3, %vm1076_vm2  ;;  %v1063_v33 = vor.u32 1.1754944e-38, %v1062_v25  ;;  %vm1061_vm9 = vcmp.eq.f32.partialorder %v1060_v27, 8.507059e+37 }
 0x423   :  { %v1072_v11 = vsub.f32 1.0, %v1071_v10 }
 0x425   :  { %v2125_v13 = vpop.eup %2124  ;;  %v1073_v14 = vmul.f32 %v2123_v62, %v1072_v11 }
 0x426   :  { %v2127_v16 = vpop.eup %2126  ;;  %v1089_v18 = vadd.f32 1.0, %v2125_v13 }
 0x427   :  { %v1052_v20 = vmul.f32 %v2127_v16, %v1050_v39  ;;  %v1074_v21 = vadd.f32 %v2123_v62, %v1073_v14  ;;  %vm1057_vm5 = vweird.f32 %v2127_v16 }
 0x428   :  { %2128 = vrcp.f32 %v1089_v18  ;;  %vm1058_vm8 = vmor %vm1056_vm6, %vm1057_vm5  ;;  %v1101_v45 = vand.u32 2147483648, %v1089_v18  ;;  %vm1095_vm12 = vweird.f32 %v1089_v18  ;;  %v1099_v47 = vand.u32 2147483647, %v1089_v18 }
 0x429   :  { %v1053_v23 = vsub.f32 1.0, %v1052_v20  ;;  %2130 = vtanh.f32 %v1023_v17  ;;  %v1078_v29 = vsel %vm1077_vm4, %v2123_v62, %v1074_v21 }
 0x42a   :  { %v1083_v34 = vsel %vm1080_vm7, %v1082_v30, %v1078_v29  ;;  %v1102_v53 = vor.u32 1.1754944e-38, %v1101_v45  ;;  %vm1100_vm14 = vcmp.eq.f32.partialorder %v1099_v47, 8.507059e+37 }
 0x42b   :  { %v1054_v26 = vmul.f32 %v2127_v16, %v1053_v23  ;;  %v1105_v40 = vmul.f32 %v1083_v34, %v2725_v55  ;;  %v2760_v55 = vld [vmem:[%s2965_s5 + $0x58] sm:$0xff] }
 0x42d   :  { %v1055_v31 = vadd.f32 %v2127_v16, %v1054_v26 }
 0x42e   :  { %v2129_v32 = vpop.eup %2128 }
 0x42f   :  { %v1059_v35 = vsel %vm1058_vm8, %v2127_v16, %v1055_v31  ;;  %v1091_v36 = vmul.f32 %v2129_v32, %v1089_v18  ;;  %v2131_v37 = vpop.eup %2130  ;;  %vm1096_vm10 = vweird.f32 %v2129_v32 }
 0x430   :  { %v1064_v38 = vsel %vm1061_vm9, %v1063_v33, %v1059_v35  ;;  %vm1097_vm13 = vmor %vm1095_vm12, %vm1096_vm10 }
 0x431   :  { %v1106_v41 = vmul.f32 %v2131_v37, %v1064_v38  ;;  %v1092_v42 = vsub.f32 1.0, %v1091_v36 }
 0x433   :  { %v2750_v43 = vadd.f32 %v1106_v41, %v1105_v40  ;;  %v1093_v44 = vmul.f32 %v2129_v32, %v1092_v42 }
 0x435   :  { %2132 = vtanh.f32 %v2750_v43  ;;  %v1094_v46 = vadd.f32 %v2129_v32, %v1093_v44 }
 0x437   :  { %v1098_v28 = vsel %vm1097_vm13, %v2129_v32, %v1094_v46 }
 0x438   :  { %v1103_v59 = vsel %vm1100_vm14, %v1102_v53, %v1098_v28 }
 0x43b   :  { %v2133_v56 = vpop.eup %2132 }
 0x43c   :  { %v1109_v4 = vmul.f32 %v2133_v56, %v1103_v59 }
 0x43e   :  { %1111 = vst.msk [vmem:[#allocation3 + $0x18] sm:$0xff] %vm273_vm11, %v1109_v4  ;;  %2007 = vmatmul.msk.f32.vlgmr.msra.gmra.mxu0 %vm273_vm11, %v1109_v4  ;;  %2008 = vmatmul.msk.f32.vlgmr.msra.gmra.mxu2 %vm273_vm11, %v1109_v4 }
 0x43f   :  { %2009 = vmatmul.msk.f32.vlgmr.msra.gmra.mxu3 %vm273_vm11, %v1109_v4  ;;  %1335 = vmatpush.msra.mxu0 %v2760_v55 }
 0x440   :  { %1449 = vmatpush.msra.mxu2 %v2766_v5  ;;  %1472 = vmatpush.msra.mxu3 %v2772_v6 }
 0x441   :  { %1336 = vmatpush.msra.mxu0 %v2778_v7 }
 0x442   :  { %1450 = vmatpush.msra.mxu2 %v2784_v8  ;;  %1473 = vmatpush.msra.mxu3 %v2790_v9 }
 0x443   :  { %1337 = vmatpush.msra.mxu0 %v2796_v48 }
 0x444   :  { %1451 = vmatpush.msra.mxu2 %v2802_v49  ;;  %1474 = vmatpush.msra.mxu3 %v2808_v50 }
 0x445   :  { %1338 = vmatpush.msra.mxu0 %v2814_v51 }
 0x446   :  { %2010 = vmatmul.msk.f32.vlgmr.msrb.gmra.mxu0 %vm273_vm11, %v1109_v4  ;;  %1452 = vmatpush.msra.mxu2 %v2821_v54 }
 0x447   :  { %1495 = vmatpush.msrb.mxu0 %v2760_v55  ;;  %1475 = vmatpush.msra.mxu3 %v2828_v58 }
 0x449   :  { %1496 = vmatpush.msrb.mxu0 %v2778_v7 }
 0x44b   :  { %1497 = vmatpush.msrb.mxu0 %v2796_v48 }
 0x44d   :  { %1498 = vmatpush.msrb.mxu0 %v2814_v51 }
 0x4bb   :  { %v1134_v0 = vpop.f32.mrf.mxu0 }
 0x4bc   :  { %v1137_v1 = vadd.f32 %v1134_v0, %v1113_v61 }
 0x4be   :  { %v2011_v52 = vmul.f32 -1.442695, %v1137_v1 }
 0x4c0   :  { %2134 = vpow2.f32 %v2011_v52 }
 0x4c1   :  { %v1157_v2 = vpop.f32.mrf.mxu2 }
 0x4c2   :  { %v1160_v57 = vadd.f32 %v1157_v2, %v1139_v63  ;;  %v1180_v21 = vpop.f32.mrf.mxu3 }
 0x4c3   :  { %v1203_v60 = vpop.f32.mrf.mxu0  ;;  %v1183_v25 = vadd.f32 %v1180_v21, %v1162_v22 }
 0x4c4   :  { %v2012_v39 = vmul.f32 -1.442695, %v1160_v57  ;;  %v1206_v62 = vadd.f32 %v1203_v60, %v1185_v3  ;;  %v2211_v3 = vld [vmem:[%s2965_s5 + $0x70] sm:$0xff] }
 0x4c6   :  { %v2135_v10 = vpop.eup %2134  ;;  %2136 = vpow2.f32 %v2012_v39  ;;  %v2013_v11 = vmul.f32 -1.442695, %v1206_v62 }
 0x4c7   :  { %v1210_v12 = vadd.f32 1.0, %v2135_v10 }
 0x4c8   :  { %2138 = vpow2.f32 %v2013_v11 }
 0x4c9   :  { %2140 = vrcp.f32 %v1210_v12  ;;  %v1222_v29 = vand.u32 2147483648, %v1210_v12  ;;  %vm1216_vm0 = vweird.f32 %v1210_v12  ;;  %v1220_v32 = vand.u32 2147483647, %v1210_v12 }
 0x4cb   :  { %v1223_v38 = vor.u32 1.1754944e-38, %v1222_v29  ;;  %vm1221_vm4 = vcmp.eq.f32.partialorder %v1220_v32, 8.507059e+37 }
 0x4cc   :  { %v2137_v13 = vpop.eup %2136 }
 0x4cd   :  { %v1229_v14 = vadd.f32 1.0, %v2137_v13 }
 0x4ce   :  { %v2139_v15 = vpop.eup %2138 }
 0x4cf   :  { %v2141_v16 = vpop.eup %2140  ;;  %2142 = vrcp.f32 %v1229_v14  ;;  %v1249_v18 = vadd.f32 1.0, %v2139_v15  ;;  %v1241_v33 = vand.u32 2147483648, %v1229_v14  ;;  %v1239_v37 = vand.u32 2147483647, %v1229_v14 }
 0x4d0   :  { %v1212_v17 = vmul.f32 %v2141_v16, %v1210_v12  ;;  %vm1217_vm15 = vweird.f32 %v2141_v16  ;;  %vm1235_vm3 = vweird.f32 %v1229_v14 }
 0x4d1   :  { %2144 = vrcp.f32 %v1249_v18  ;;  %vm1218_vm1 = vmor %vm1216_vm0, %vm1217_vm15  ;;  %v1242_v42 = vor.u32 1.1754944e-38, %v1241_v33  ;;  %vm1240_vm6 = vcmp.eq.f32.partialorder %v1239_v37, 8.507059e+37  ;;  %v1261_v61 = vand.u32 2147483648, %v1249_v18 }
 0x4d2   :  { %v1213_v20 = vsub.f32 1.0, %v1212_v17  ;;  %2146 = vtanh.f32 %v1183_v25  ;;  %vm1255_vm8 = vweird.f32 %v1249_v18  ;;  %v1259_v0 = vand.u32 2147483647, %v1249_v18  ;;  %v1322_v17 = vld [vmem:[#allocation2 + $0xa8] sm:$0xff] }
 0x4d3   :  { %v1262_v52 = vor.u32 1.1754944e-38, %v1261_v61 }
 0x4d4   :  { %v1214_v23 = vmul.f32 %v2141_v16, %v1213_v20  ;;  %vm1260_vm10 = vcmp.eq.f32.partialorder %v1259_v0, 8.507059e+37 }
 0x4d5   :  { %v2143_v24 = vpop.eup %2142 }
 0x4d6   :  { %v1231_v26 = vmul.f32 %v2143_v24, %v1229_v14  ;;  %v1215_v27 = vadd.f32 %v2141_v16, %v1214_v23  ;;  %vm1236_vm2 = vweird.f32 %v2143_v24 }
 0x4d7   :  { %v2145_v30 = vpop.eup %2144  ;;  %vm1237_vm5 = vmor %vm1235_vm3, %vm1236_vm2 }
 0x4d8   :  { %v1232_v31 = vsub.f32 1.0, %v1231_v26  ;;  %v1251_v34 = vmul.f32 %v2145_v30, %v1249_v18  ;;  %v1219_v36 = vsel %vm1218_vm1, %v2141_v16, %v1215_v27  ;;  %v2147_v46 = vpop.eup %2146  ;;  %vm1256_vm7 = vweird.f32 %v2145_v30 }
 0x4d9   :  { %v1224_v44 = vsel %vm1221_vm4, %v1223_v38, %v1219_v36  ;;  %vm1257_vm9 = vmor %vm1255_vm8, %vm1256_vm7 }
 0x4da   :  { %v1233_v35 = vmul.f32 %v2143_v24, %v1232_v31  ;;  %v1252_v40 = vsub.f32 1.0, %v1251_v34  ;;  %v1266_v56 = vmul.f32 %v2147_v46, %v1224_v44 }
 0x4dc   :  { %v1234_v41 = vadd.f32 %v2143_v24, %v1233_v35  ;;  %v1253_v28 = vmul.f32 %v2145_v30, %v1252_v40 }
 0x4de   :  { %v1238_v45 = vsel %vm1237_vm5, %v2143_v24, %v1234_v41  ;;  %v1254_v4 = vadd.f32 %v2145_v30, %v1253_v28 }
 0x4df   :  { %v1243_v47 = vsel %vm1240_vm6, %v1242_v42, %v1238_v45 }
 0x4e0   :  { %v1265_v53 = vmul.f32 %v1243_v47, %v2750_v43  ;;  %v1258_v1 = vsel %vm1257_vm9, %v2145_v30, %v1254_v4  ;;  %v2210_v43 = vld [vmem:[%s2965_s5 + $0x78] sm:$0xff] }
 0x4e1   :  { %v1263_v2 = vsel %vm1260_vm10, %v1262_v52, %v1258_v1 }
 0x4e2   :  { %v2835_v59 = vadd.f32 %v1266_v56, %v1265_v53 }
 0x4e4   :  { %2148 = vtanh.f32 %v2835_v59 }
 0x4ea   :  { %v2149_v63 = vpop.eup %2148 }
 0x4eb   :  { %v1269_v57 = vmul.f32 %v2149_v63, %v1263_v2 }
 0x4ed   :  { %1271 = vst.msk [vmem:[#allocation3 + $0x20] sm:$0xff] %vm273_vm11, %v1269_v57  ;;  %2014 = vmatmul.msk.f32.vlgmr.msrb.gmra.mxu2 %vm273_vm11, %v1269_v57  ;;  %2015 = vmatmul.msk.f32.vlgmr.msrb.gmra.mxu3 %vm273_vm11, %v1269_v57 }
 0x4ee   :  { %2016 = vmatmul.msk.f32.vlgmr.msra.gmra.mxu0 %vm273_vm11, %v1269_v57  ;;  %2017 = vmatmul.msk.f32.vlgmr.msrb.gmra.mxu1 %vm273_vm11, %v1269_v57 }
 0x4ef   :  { %1609 = vmatpush.msrb.mxu2 %v2766_v5  ;;  %1632 = vmatpush.msrb.mxu3 %v2772_v6  ;;  %v2213_v5 = vld [vmem:[%s2965_s5 + $0x60] sm:$0xff]  ;;  %v1345_v6 = vld [vmem:[#allocation2 + $0xe8] sm:$0xff] }
 0x4f0   :  { %1655 = vmatpush.msra.mxu0 %v2760_v55  ;;  %1678 = vmatpush.msrb.mxu1 %v2210_v43  ;;  %v2212_v55 = vld [vmem:[%s2965_s5 + $0x68] sm:$0xff] }
 0x4f1   :  { %1610 = vmatpush.msrb.mxu2 %v2784_v8  ;;  %1633 = vmatpush.msrb.mxu3 %v2790_v9 }
 0x4f2   :  { %1656 = vmatpush.msra.mxu0 %v2778_v7  ;;  %1679 = vmatpush.msrb.mxu1 %v2211_v3 }
 0x4f3   :  { %1611 = vmatpush.msrb.mxu2 %v2802_v49  ;;  %1634 = vmatpush.msrb.mxu3 %v2808_v50  ;;  %v1299_v50 = vld [vmem:[#allocation2 + $0x68] sm:$0xff] }
 0x4f4   :  { %1657 = vmatpush.msra.mxu0 %v2796_v48  ;;  %1680 = vmatpush.msrb.mxu1 %v2212_v55  ;;  %v1273_v48 = vld [vmem:[#allocation2 + $0x28] sm:$0xff]  ;;  %v1433_v55 = vld [vmem:[#allocation2 + $0x30] sm:$0xff] }
 0x4f5   :  { %1612 = vmatpush.msrb.mxu2 %v2821_v54  ;;  %1635 = vmatpush.msrb.mxu3 %v2828_v58 }
 0x4f6   :  { %1658 = vmatpush.msra.mxu0 %v2814_v51  ;;  %1681 = vmatpush.msrb.mxu1 %v2213_v5 }
 0x56b   :  { %v1363_v7 = vpop.f32.mrf.mxu1  ;;  %v1340_v15 = vpop.f32.mrf.mxu0 }
 0x56c   :  { %v1366_v8 = vadd.f32 %v1363_v7, %v1345_v6  ;;  %v1343_v20 = vadd.f32 %v1340_v15, %v1322_v17  ;;  %v1459_v6 = vld [vmem:[#allocation2 + $0x70] sm:$0xff] }
 0x56d   :  { %v1482_v15 = vld [vmem:[#allocation2 + $0xb0] sm:$0xff] }
 0x56e   :  { %v2020_v9 = vmul.f32 -1.442695, %v1366_v8 }
 0x570   :  { %2150 = vpow2.f32 %v2020_v9  ;;  %v1294_v49 = vpop.f32.mrf.mxu2  ;;  %v1317_v60 = vpop.f32.mrf.mxu3 }
 0x571   :  { %v1297_v39 = vadd.f32 %v1294_v49, %v1273_v48  ;;  %v1320_v54 = vadd.f32 %v1317_v60, %v1299_v50 }
 0x573   :  { %v2018_v62 = vmul.f32 -1.442695, %v1297_v39  ;;  %v2019_v58 = vmul.f32 -1.442695, %v1320_v54 }
 0x575   :  { %2152 = vpow2.f32 %v2018_v62 }
 0x576   :  { %v2151_v51 = vpop.eup %2150  ;;  %2154 = vpow2.f32 %v2019_v58 }
 0x577   :  { %v1409_v10 = vadd.f32 1.0, %v2151_v51  ;;  %v1811_v51 = vld [vmem:[#allocation7 + $0x18] sm:$0xff] }
 0x579   :  { %2156 = vrcp.f32 %v1409_v10  ;;  %v1421_v4 = vand.u32 2147483648, %v1409_v10  ;;  %vm1415_vm5 = vweird.f32 %v1409_v10  ;;  %v1419_v61 = vand.u32 2147483647, %v1409_v10 }
 0x57b   :  { %v2153_v11 = vpop.eup %2152  ;;  %v1422_v1 = vor.u32 1.1754944e-38, %v1421_v4  ;;  %vm1420_vm7 = vcmp.eq.f32.partialorder %v1419_v61, 8.507059e+37  ;;  %v1760_v61 = vld [vmem:[%s2969_s9] sm:$0xff] }
 0x57c   :  { %v2155_v12 = vpop.eup %2154  ;;  %v1370_v13 = vadd.f32 1.0, %v2153_v11  ;;  %v1809_v11 = vld [vmem:[#allocation7 + $0x8] sm:$0xff] }
 0x57d   :  { %v1389_v14 = vadd.f32 1.0, %v2155_v12 }
 0x57e   :  { %2158 = vrcp.f32 %v1370_v13  ;;  %v1382_v26 = vand.u32 2147483648, %v1370_v13  ;;  %v1380_v30 = vand.u32 2147483647, %v1370_v13  ;;  %vm1376_vm14 = vweird.f32 %v1370_v13 }
 0x57f   :  { %2160 = vrcp.f32 %v1389_v14  ;;  %v2157_v16 = vpop.eup %2156  ;;  %v1401_v31 = vand.u32 2147483648, %v1389_v14  ;;  %v1399_v33 = vand.u32 2147483647, %v1389_v14  ;;  %vm1395_vm0 = vweird.f32 %v1389_v14 }
 0x580   :  { %v1411_v24 = vmul.f32 %v2157_v16, %v1409_v10  ;;  %2162 = vtanh.f32 %v1343_v20  ;;  %v1383_v36 = vor.u32 1.1754944e-38, %v1382_v26  ;;  %vm1381_vm1 = vcmp.eq.f32.partialorder %v1380_v30, 8.507059e+37  ;;  %v1810_v10 = vld [vmem:[#allocation7 + $0x10] sm:$0xff] }
 0x581   :  { %v1402_v40 = vor.u32 1.1754944e-38, %v1401_v31  ;;  %vm1400_vm3 = vcmp.eq.f32.partialorder %v1399_v33, 8.507059e+37  ;;  %vm1416_vm4 = vweird.f32 %v2157_v16 }
 0x582   :  { %v1412_v34 = vsub.f32 1.0, %v1411_v24  ;;  %vm1417_vm6 = vmor %vm1415_vm5, %vm1416_vm4  ;;  %vm1768_vm5 = vcmp.lt.f32.partialorder %v1760_v61, 0.4 }
 0x584   :  { %v2159_v18 = vpop.eup %2158  ;;  %v1413_v45 = vmul.f32 %v2157_v16, %v1412_v34 }
 0x585   :  { %v2161_v21 = vpop.eup %2160  ;;  %v1372_v22 = vmul.f32 %v2159_v18, %v1370_v13  ;;  %vm1377_vm12 = vweird.f32 %v2159_v18  ;;  %v1808_v13 = vld [vmem:[#allocation7] sm:$0xff] }
 0x586   :  { %v1391_v23 = vmul.f32 %v2161_v21, %v1389_v14  ;;  %vm1396_vm13 = vweird.f32 %v2161_v21  ;;  %vm1378_vm15 = vmor %vm1376_vm14, %vm1377_vm12  ;;  %v2163_v41 = vpop.eup %2162  ;;  %v1414_v56 = vadd.f32 %v2157_v16, %v1413_v45 }
 0x587   :  { %v1373_v25 = vsub.f32 1.0, %v1372_v22  ;;  %vm1397_vm2 = vmor %vm1395_vm0, %vm1396_vm13 }
 0x588   :  { %v1392_v27 = vsub.f32 1.0, %v1391_v23  ;;  %v1418_v0 = vsel %vm1417_vm6, %v2157_v16, %v1414_v56 }
 0x589   :  { %v1374_v29 = vmul.f32 %v2159_v18, %v1373_v25  ;;  %v1423_v63 = vsel %vm1420_vm7, %v1422_v1, %v1418_v0 }
 0x58a   :  { %v1393_v32 = vmul.f32 %v2161_v21, %v1392_v27 }
 0x58b   :  { %v1375_v35 = vadd.f32 %v2159_v18, %v1374_v29 }
 0x58c   :  { %v1394_v37 = vadd.f32 %v2161_v21, %v1393_v32 }
 0x58d   :  { %v1379_v38 = vsel %vm1378_vm15, %v2159_v18, %v1375_v35 }
 0x58e   :  { %v1384_v42 = vsel %vm1381_vm1, %v1383_v36, %v1379_v38  ;;  %v1398_v44 = vsel %vm1397_vm2, %v2161_v21, %v1394_v37 }
 0x58f   :  { %v1426_v46 = vmul.f32 %v2163_v41, %v1384_v42  ;;  %v1403_v47 = vsel %vm1400_vm3, %v1402_v40, %v1398_v44 }
 0x590   :  { %v1425_v28 = vmul.f32 %v1403_v47, %v2835_v59  ;;  %v1505_v59 = vld [vmem:[#allocation2 + $0xf0] sm:$0xff] }
 0x592   :  { %v2868_v53 = vadd.f32 %v1426_v46, %v1425_v28 }
 0x594   :  { %2164 = vtanh.f32 %v2868_v53 }
 0x59a   :  { %v2165_v52 = vpop.eup %2164 }
 0x59b   :  { %v1429_v2 = vmul.f32 %v2165_v52, %v1423_v63 }
 0x59d   :  { %1431 = vst.msk [vmem:[#allocation3 + $0x28] sm:$0xff] %vm273_vm11, %v1429_v2  ;;  %2021 = vmatmul.msk.f32.vlgmr.msra.gmra.mxu2 %vm273_vm11, %v1429_v2  ;;  %2022 = vmatmul.msk.f32.vlgmr.msra.gmra.mxu3 %vm273_vm11, %v1429_v2 }
 0x59e   :  { %2023 = vmatmul.msk.f32.vlgmr.msrb.gmra.mxu0 %vm273_vm11, %v1429_v2  ;;  %2024 = vmatmul.msk.f32.vlgmr.msra.gmra.mxu1 %vm273_vm11, %v1429_v2  ;;  %v1752_v2 = vld [vmem:[#allocation3] sm:$0xff] }
 0x59f   :  { %1852 = vmatpush.msra.mxu2 %v1811_v51 }
 0x5a1   :  { %1853 = vmatpush.msra.mxu2 %v1810_v10  ;;  %v1756_v10 = vld [vmem:[#allocation3 + $0x20] sm:$0xff] }
 0x5a3   :  { %1854 = vmatpush.msra.mxu2 %v1809_v11 }
 0x5a5   :  { %1855 = vmatpush.msra.mxu2 %v1808_v13 }
 0x61b   :  { %v1523_v57 = vpop.f32.mrf.mxu1  ;;  %v1500_v12 = vpop.f32.mrf.mxu0 }
 0x61c   :  { %v1526_v43 = vadd.f32 %v1523_v57, %v1505_v59  ;;  %v1503_v17 = vadd.f32 %v1500_v12, %v1482_v15  ;;  %v2035_v59 = vsel %vm1768_vm5, 1.0, %v2297_v19  ;;  %v1761_v57 = vld [vmem:[%s2969_s9 + $0x8] sm:$0xff] }
 0x61d   :  { %vm1769_vm6 = vcmp.lt.f32.partialorder %v1761_v57, 0.4  ;;  %v1765_v12 = vld [vmem:[%s2969_s9 + $0x28] sm:$0xff] }
 0x61e   :  { %v2027_v3 = vmul.f32 -1.442695, %v1526_v43  ;;  %v1792_v43 = vmul.f32 %v2035_v59, %v1752_v2  ;;  %v1757_v15 = vld [vmem:[#allocation3 + $0x28] sm:$0xff] }
 0x620   :  { %2166 = vpow2.f32 %v2027_v3  ;;  %v1454_v5 = vpop.f32.mrf.mxu2  ;;  %v1477_v7 = vpop.f32.mrf.mxu3  ;;  %v1800_v3 = vmul.f32 2.5, %v1792_v43 }
 0x621   :  { %v1457_v8 = vadd.f32 %v1454_v5, %v1433_v55  ;;  %v1480_v9 = vadd.f32 %v1477_v7, %v1459_v6  ;;  %v1753_v55 = vld [vmem:[#allocation3 + $0x8] sm:$0xff]  ;;  %v2036_v5 = vsel %vm1769_vm6, 1.0, %v2297_v19  ;;  %v1762_v6 = vld [vmem:[%s2969_s9 + $0x10] sm:$0xff] }
 0x622   :  { %v1793_v7 = vmul.f32 %v2036_v5, %v1753_v55  ;;  %vm1770_vm7 = vcmp.lt.f32.partialorder %v1762_v6, 0.4 }
 0x623   :  { %v2025_v48 = vmul.f32 -1.442695, %v1457_v8  ;;  %v2026_v49 = vmul.f32 -1.442695, %v1480_v9  ;;  %v1754_v9 = vld [vmem:[#allocation3 + $0x10] sm:$0xff] }
 0x624   :  { %v1801_v8 = vmul.f32 2.5, %v1793_v7 }
 0x625   :  { %2168 = vpow2.f32 %v2025_v48  ;;  %v2037_v48 = vsel %vm1770_vm7, 1.0, %v2297_v19 }
 0x626   :  { %v2167_v50 = vpop.eup %2166  ;;  %2170 = vpow2.f32 %v2026_v49  ;;  %v1763_v49 = vld [vmem:[%s2969_s9 + $0x18] sm:$0xff] }
 0x627   :  { %v2876_v60 = vadd.f32 1.0, %v2167_v50  ;;  %v1794_v50 = vmul.f32 %v2037_v48, %v1754_v9 }
 0x629   :  { %2172 = vrcp.f32 %v2876_v60  ;;  %v1581_v56 = vand.u32 2147483648, %v2876_v60  ;;  %vm1575_vm2 = vweird.f32 %v2876_v60  ;;  %v1579_v4 = vand.u32 2147483647, %v2876_v60 }
 0x62b   :  { %v2169_v39 = vpop.eup %2168  ;;  %v1582_v1 = vor.u32 1.1754944e-38, %v1581_v56  ;;  %vm1580_vm4 = vcmp.eq.f32.partialorder %v1579_v4, 8.507059e+37 }
 0x62c   :  { %v2171_v54 = vpop.eup %2170  ;;  %v1530_v62 = vadd.f32 1.0, %v2169_v39  ;;  %v1755_v39 = vld [vmem:[#allocation3 + $0x18] sm:$0xff] }
 0x62d   :  { %v1549_v58 = vadd.f32 1.0, %v2171_v54 }
 0x62e   :  { %2174 = vrcp.f32 %v1530_v62  ;;  %v1542_v24 = vand.u32 2147483648, %v1530_v62  ;;  %v1540_v27 = vand.u32 2147483647, %v1530_v62  ;;  %vm1536_vm10 = vweird.f32 %v1530_v62 }
 0x62f   :  { %2176 = vrcp.f32 %v1549_v58  ;;  %v2173_v14 = vpop.eup %2172  ;;  %v1561_v29 = vand.u32 2147483648, %v1549_v58  ;;  %v1559_v31 = vand.u32 2147483647, %v1549_v58  ;;  %vm1555_vm13 = vweird.f32 %v1549_v58 }
 0x630   :  { %v1571_v22 = vmul.f32 %v2173_v14, %v2876_v60  ;;  %2178 = vtanh.f32 %v1503_v17  ;;  %v1543_v34 = vor.u32 1.1754944e-38, %v1542_v24  ;;  %vm1541_vm14 = vcmp.eq.f32.partialorder %v1540_v27, 8.507059e+37  ;;  %v1766_v17 = vld [vmem:[%s2969_s9 + $0x30] sm:$0xff] }
 0x631   :  { %v1562_v37 = vor.u32 1.1754944e-38, %v1561_v29  ;;  %vm1560_vm0 = vcmp.eq.f32.partialorder %v1559_v31, 8.507059e+37  ;;  %vm1576_vm1 = vweird.f32 %v2173_v14  ;;  %v1802_v60 = vmul.f32 2.5, %v1794_v50 }
 0x632   :  { %v1572_v32 = vsub.f32 1.0, %v1571_v22  ;;  %vm1577_vm3 = vmor %vm1575_vm2, %vm1576_vm1 }
 0x634   :  { %v2175_v16 = vpop.eup %2174  ;;  %v1573_v42 = vmul.f32 %v2173_v14, %v1572_v32  ;;  %v1619_v32 = vld [vmem:[#allocation2 + $0x78] sm:$0xff] }
 0x635   :  { %v2177_v18 = vpop.eup %2176  ;;  %v1532_v20 = vmul.f32 %v2175_v16, %v1530_v62  ;;  %vm1537_vm8 = vweird.f32 %v2175_v16  ;;  %v1764_v62 = vld [vmem:[%s2969_s9 + $0x20] sm:$0xff] }
 0x636   :  { %v1551_v21 = vmul.f32 %v2177_v18, %v1549_v58  ;;  %vm1556_vm9 = vweird.f32 %v2177_v18  ;;  %vm1538_vm12 = vmor %vm1536_vm10, %vm1537_vm8  ;;  %v2179_v38 = vpop.eup %2178  ;;  %v1574_v28 = vadd.f32 %v2173_v14, %v1573_v42  ;;  %vm1771_vm8 = vcmp.lt.f32.partialorder %v1763_v49, 0.4 }
 0x637   :  { %v1533_v23 = vsub.f32 1.0, %v1532_v20  ;;  %vm1557_vm15 = vmor %vm1555_vm13, %vm1556_vm9  ;;  %v2038_v54 = vsel %vm1771_vm8, 1.0, %v2297_v19  ;;  %vm1772_vm9 = vcmp.lt.f32.partialorder %v1764_v62, 0.4  ;;  %vm1773_vm10 = vcmp.lt.f32.partialorder %v1765_v12, 0.4 }
 0x638   :  { %v1552_v25 = vsub.f32 1.0, %v1551_v21  ;;  %v1578_v0 = vsel %vm1577_vm3, %v2173_v14, %v1574_v28  ;;  %v1795_v58 = vmul.f32 %v2038_v54, %v1755_v39  ;;  %v2039_v11 = vsel %vm1772_vm9, 1.0, %v2297_v19 }
 0x639   :  { %v1534_v26 = vmul.f32 %v2175_v16, %v1533_v23  ;;  %v1583_v52 = vsel %vm1580_vm4, %v1582_v1, %v1578_v0  ;;  %v1796_v13 = vmul.f32 %v2039_v11, %v1756_v10 }
 0x63a   :  { %v1553_v30 = vmul.f32 %v2177_v18, %v1552_v25  ;;  %v1803_v51 = vmul.f32 2.5, %v1795_v58  ;;  %v1665_v25 = vld [vmem:[#allocation2 + $0xf8] sm:$0xff] }
 0x63b   :  { %v1535_v33 = vadd.f32 %v2175_v16, %v1534_v26  ;;  %v1804_v14 = vmul.f32 2.5, %v1796_v13 }
 0x63c   :  { %v1554_v35 = vadd.f32 %v2177_v18, %v1553_v30  ;;  %v1593_v30 = vld [vmem:[#allocation2 + $0x38] sm:$0xff] }
 0x63d   :  { %v1539_v36 = vsel %vm1538_vm12, %v2175_v16, %v1535_v33  ;;  %v2040_v16 = vsel %vm1773_vm10, 1.0, %v2297_v19  ;;  %vm1774_vm12 = vcmp.lt.f32.partialorder %v1766_v17, 0.4 }
 0x63e   :  { %v1544_v40 = vsel %vm1541_vm14, %v1543_v34, %v1539_v36  ;;  %v1558_v41 = vsel %vm1557_vm15, %v2177_v18, %v1554_v35  ;;  %v1797_v18 = vmul.f32 %v2040_v16, %v1757_v15  ;;  %v2041_v22 = vsel %vm1774_vm12, 1.0, %v2297_v19 }
 0x63f   :  { %v1586_v44 = vmul.f32 %v2179_v38, %v1544_v40  ;;  %v1563_v45 = vsel %vm1560_vm0, %v1562_v37, %v1558_v41  ;;  %v2930_v40 = vld [vmem:[%s2968_s8] ss:$0 sm:$0xff] }
 0x640   :  { %v1585_v46 = vmul.f32 %v1563_v45, %v2868_v53  ;;  %v1805_v20 = vmul.f32 2.5, %v1797_v18 }
 0x642   :  { %v2881_v47 = vadd.f32 %v1586_v44, %v1585_v46 }
 0x644   :  { %2180 = vtanh.f32 %v2881_v47 }
 0x64a   :  { %v2181_v53 = vpop.eup %2180 }
 0x64b   :  { %v1589_v63 = vmul.f32 %v2181_v53, %v1583_v52  ;;  %v1642_v53 = vld [vmem:[#allocation2 + $0xb8] sm:$0xff] }
 0x64d   :  { %1591 = vst.msk [vmem:[#allocation3 + $0x30] sm:$0xff] %vm273_vm11, %v1589_v63  ;;  %2028 = vmatmul.msk.f32.vlgmr.msrb.gmra.mxu2 %vm273_vm11, %v1589_v63  ;;  %2029 = vmatmul.msk.f32.vlgmr.msrb.gmra.mxu3 %vm273_vm11, %v1589_v63 }
 0x64e   :  { %2030 = vmatmul.msk.f32.vlgmr.msra.gmra.mxu0 %vm273_vm11, %v1589_v63  ;;  %2031 = vmatmul.msk.f32.vlgmr.msrb.gmra.mxu1 %vm273_vm11, %v1589_v63 }
 0x654   :  { %v1758_v21 = vld [vmem:[#allocation3 + $0x30] sm:$0xff] }
 0x655   :  { %2043 = vmatmul.msk.f32.vlgmr.msra.gmra.mxu2 %vm273_vm11, %v1800_v3  ;;  %v1798_v23 = vmul.f32 %v2041_v22, %v1758_v21 }
 0x657   :  { %v1806_v24 = vmul.f32 2.5, %v1798_v23 }
 0x65d   :  { %2044 = vmatmul.msk.f32.gmra.mxu2 %vm273_vm11, %v1801_v8 }
 0x665   :  { %2045 = vmatmul.msk.f32.gmra.mxu2 %vm273_vm11, %v1802_v60 }
 0x66d   :  { %2046 = vmatmul.msk.f32.gmra.mxu2 %vm273_vm11, %v1803_v51 }
 0x675   :  { %2047 = vmatmul.msk.f32.gmra.mxu2 %vm273_vm11, %v1804_v14 }
 0x67d   :  { %2048 = vmatmul.msk.f32.gmra.mxu2 %vm273_vm11, %v1805_v20 }
 0x685   :  { %2049 = vmatmul.msk.f32.gmra.mxu2 %vm273_vm11, %v1806_v24 }
 0x6cb   :  { %v1683_v26 = vpop.f32.mrf.mxu1  ;;  %v1660_v61 = vpop.f32.mrf.mxu0 }
 0x6cc   :  { %v1686_v27 = vadd.f32 %v1683_v26, %v1665_v25  ;;  %v1663_v63 = vadd.f32 %v1660_v61, %v1642_v53 }
 0x6ce   :  { %v2034_v29 = vmul.f32 -1.442695, %v1686_v27 }
 0x6d0   :  { %2182 = vpow2.f32 %v2034_v29  ;;  %v1614_v31 = vpop.f32.mrf.mxu2  ;;  %v1637_v33 = vpop.f32.mrf.mxu3 }
 0x6d1   :  { %v1617_v34 = vadd.f32 %v1614_v31, %v1593_v30  ;;  %v1640_v35 = vadd.f32 %v1637_v33, %v1619_v32  ;;  %v1767_v31 = vld [vmem:[%s2969_s9 + $0x38] sm:$0xff]  ;;  %s1893_s9 = sshll.u32 %s2298_s1, 4  ;;  %s1894_s9 = int_to_ptr.vmem [resolvable:$true] %s1893_s9 }
 0x6d2   :  { %vm1775_vm9 = vcmp.lt.f32.partialorder %v1767_v31, 0.4 }
 0x6d3   :  { %v2032_v36 = vmul.f32 -1.442695, %v1617_v34  ;;  %v2033_v37 = vmul.f32 -1.442695, %v1640_v35  ;;  %v2042_v34 = vsel %vm1775_vm9, 1.0, %v2297_v19 }
 0x6d5   :  { %2184 = vpow2.f32 %v2032_v36 }
 0x6d6   :  { %v2183_v38 = vpop.eup %2182  ;;  %2186 = vpow2.f32 %v2033_v37 }
 0x6d7   :  { %v2932_v42 = vadd.f32 1.0, %v2183_v38 }
 0x6d8   :  { %v1857_v41 = vpop.f32.mrf.mxu2 }
 0x6d9   :  { %v1858_v44 = vadd.f32 %v2930_v40, %v1857_v41  ;;  %2188 = vrcp.f32 %v2932_v42  ;;  %v1741_v22 = vand.u32 2147483648, %v2932_v42  ;;  %vm1735_vm6 = vweird.f32 %v2932_v42 }
 0x6da   :  { %v1739_v23 = vand.u32 2147483647, %v2932_v42 }
 0x6db   :  { %v2185_v45 = vpop.eup %2184  ;;  %1881 = vst [vmem:[#allocation9] sm:$0xff] %v1858_v44  ;;  %v1742_v25 = vor.u32 1.1754944e-38, %v1741_v22 }
 0x6dc   :  { %v2187_v46 = vpop.eup %2186  ;;  %v1690_v28 = vadd.f32 1.0, %v2185_v45  ;;  %vm1740_vm8 = vcmp.eq.f32.partialorder %v1739_v23, 8.507059e+37 }
 0x6dd   :  { %v1709_v56 = vadd.f32 1.0, %v2187_v46 }
 0x6de   :  { %2190 = vrcp.f32 %v1690_v28  ;;  %v1700_v55 = vand.u32 2147483647, %v1690_v28  ;;  %v1702_v5 = vand.u32 2147483648, %v1690_v28  ;;  %vm1696_vm15 = vweird.f32 %v1690_v28 }
 0x6df   :  { %2192 = vrcp.f32 %v1709_v56  ;;  %v2189_v1 = vpop.eup %2188  ;;  %v1721_v9 = vand.u32 2147483648, %v1709_v56  ;;  %v1719_v50 = vand.u32 2147483647, %v1709_v56  ;;  %vm1715_vm1 = vweird.f32 %v1709_v56 }
 0x6e0   :  { %v1860_v4 = vpop.f32.mrf.mxu2  ;;  %v1731_v43 = vmul.f32 %v2189_v1, %v2932_v42  ;;  %2194 = vtanh.f32 %v1663_v63  ;;  %v1703_v54 = vor.u32 1.1754944e-38, %v1702_v5  ;;  %vm1701_vm2 = vcmp.eq.f32.partialorder %v1700_v55, 8.507059e+37 }
 0x6e1   :  { %v1861_v0 = vadd.f32 %v2930_v40, %v1860_v4  ;;  %v1722_v51 = vor.u32 1.1754944e-38, %v1721_v9  ;;  %vm1720_vm4 = vcmp.eq.f32.partialorder %v1719_v50, 8.507059e+37  ;;  %vm1736_vm5 = vweird.f32 %v2189_v1 }
 0x6e2   :  { %v1732_v60 = vsub.f32 1.0, %v1731_v43  ;;  %vm1737_vm7 = vmor %vm1735_vm6, %vm1736_vm5 }
 0x6e3   :  { %1882 = vst [vmem:[#allocation9 + $0x8] sm:$0xff] %v1861_v0 }
 0x6e4   :  { %v2191_v52 = vpop.eup %2190  ;;  %v1733_v13 = vmul.f32 %v2189_v1, %v1732_v60 }
 0x6e5   :  { %v2193_v2 = vpop.eup %2192  ;;  %v1692_v59 = vmul.f32 %v2191_v52, %v1690_v28  ;;  %vm1697_vm13 = vweird.f32 %v2191_v52 }
 0x6e6   :  { %v1711_v57 = vmul.f32 %v2193_v2, %v1709_v56  ;;  %vm1716_vm14 = vweird.f32 %v2193_v2  ;;  %vm1698_vm0 = vmor %vm1696_vm15, %vm1697_vm13  ;;  %v2195_v10 = vpop.eup %2194  ;;  %v1734_v21 = vadd.f32 %v2189_v1, %v1733_v13 }
 0x6e7   :  { %v1693_v3 = vsub.f32 1.0, %v1692_v59  ;;  %vm1717_vm3 = vmor %vm1715_vm1, %vm1716_vm14 }
 0x6e8   :  { %v1712_v6 = vsub.f32 1.0, %v1711_v57  ;;  %v1863_v7 = vpop.f32.mrf.mxu2  ;;  %v1738_v24 = vsel %vm1737_vm7, %v2189_v1, %v1734_v21 }
 0x6e9   :  { %v1694_v8 = vmul.f32 %v2191_v52, %v1693_v3  ;;  %v1864_v48 = vadd.f32 %v2930_v40, %v1863_v7  ;;  %v1743_v29 = vsel %vm1740_vm8, %v1742_v25, %v1738_v24 }
 0x6ea   :  { %v1713_v49 = vmul.f32 %v2193_v2, %v1712_v6 }
 0x6eb   :  { %v1695_v39 = vadd.f32 %v2191_v52, %v1694_v8  ;;  %1883 = vst [vmem:[#allocation9 + $0x10] sm:$0xff] %v1864_v48 }
 0x6ec   :  { %v1714_v62 = vadd.f32 %v2193_v2, %v1713_v49 }
 0x6ed   :  { %v1699_v58 = vsel %vm1698_vm0, %v2191_v52, %v1695_v39 }
 0x6ee   :  { %v1704_v11 = vsel %vm1701_vm2, %v1703_v54, %v1699_v58  ;;  %v1718_v12 = vsel %vm1717_vm3, %v2193_v2, %v1714_v62 }
 0x6ef   :  { %v1746_v14 = vmul.f32 %v2195_v10, %v1704_v11  ;;  %v1723_v15 = vsel %vm1720_vm4, %v1722_v51, %v1718_v12 }
 0x6f0   :  { %v1745_v16 = vmul.f32 %v1723_v15, %v2881_v47  ;;  %v1866_v17 = vpop.f32.mrf.mxu2 }
 0x6f1   :  { %v1867_v18 = vadd.f32 %v2930_v40, %v1866_v17 }
 0x6f2   :  { %v1747_v20 = vadd.f32 %v1746_v14, %v1745_v16 }
 0x6f3   :  { %1884 = vst [vmem:[#allocation9 + $0x18] sm:$0xff] %v1867_v18 }
 0x6f4   :  { %2196 = vtanh.f32 %v1747_v20 }
 0x6f8   :  { %v1869_v26 = vpop.f32.mrf.mxu2 }
 0x6f9   :  { %v1870_v47 = vadd.f32 %v2930_v40, %v1869_v26 }
 0x6fa   :  { %v2197_v27 = vpop.eup %2196 }
 0x6fb   :  { %v1749_v30 = vmul.f32 %v2197_v27, %v1743_v29  ;;  %1885 = vst [vmem:[#allocation9 + $0x20] sm:$0xff] %v1870_v47 }
 0x6fd   :  { %1751 = vst.msk [vmem:[#allocation3 + $0x38] sm:$0xff] %vm273_vm11, %v1749_v30 }
 0x700   :  { %v1872_v32 = vpop.f32.mrf.mxu2 }
 0x701   :  { %v1873_v33 = vadd.f32 %v2930_v40, %v1872_v32 }
 0x703   :  { %1886 = vst [vmem:[#allocation9 + $0x28] sm:$0xff] %v1873_v33 }
 0x704   :  { %v1759_v35 = vld [vmem:[#allocation3 + $0x38] sm:$0xff] }
 0x705   :  { %v1799_v36 = vmul.f32 %v2042_v34, %v1759_v35 }
 0x707   :  { %v1807_v37 = vmul.f32 2.5, %v1799_v36 }
 0x708   :  { %v1875_v38 = vpop.f32.mrf.mxu2 }
 0x709   :  { %v1876_v41 = vadd.f32 %v2930_v40, %v1875_v38  ;;  %2050 = vmatmul.msk.f32.gmra.mxu2 %vm273_vm11, %v1807_v37 }
 0x70b   :  { %1887 = vst [vmem:[#allocation9 + $0x30] sm:$0xff] %v1876_v41 }
 0x78c   :  { %v1878_v42 = vpop.f32.mrf.mxu2 }
 0x78d   :  { %v1879_v44 = vadd.f32 %v2930_v40, %v1878_v42 }
 0x78f   :  { %1888 = vst [vmem:[#allocation9 + $0x38] sm:$0xff] %v1879_v44 }
 0x790   :  { %1901 = dma.vmem_to_hbm [thread:$0]  %s1894_s9, 1024, %s1896_s21, [#allocation6], %s2294_s23, %s2294_s23, %s2295_s24  }
 0x791   :  { %2290 = dma.done.wait [#allocation6], 1024  }
 0x792   :  { %2291 = vsyncadd [#allocation6], 4294966272 }
 0x793   :  { %1906 = vsyncpa [#allocation5], 1 }
 0x794   :  { %1907 = vsyncpa [#allocation8], 1 }
 0x795   :  { %1908 = vsyncpa [#allocation6], 1 }

</bundles_post_ra>
